<compile_context>
chip_gen: v5e
topology: v5e:2x2
jax: 0.10.0
libtpu: 0.0.40
codegen_flags: <defaults>
</compile_context>

<pallas_src>
import jax
import jax.numpy as jnp
from jax.experimental import pallas as pl
from jax.experimental.pallas import tpu as pltpu

HIDDEN = 768        # BERT hidden size
FC1_OUT = 512       # fc1 output size
SERVICES_COUNT = 7  # number of target classes
C_PAD = 128         # lane-aligned padded class dim (real logits live in [:SERVICES_COUNT])
NEG_INF = -1e30     # f32 bias on padded class columns
TB_CAP = 1024       # max batch tile (multiple of 16; ~6 MiB double-buffered VMEM)


def _round_up(x, m):
    return ((x + m - 1) // m) * m


def _head_kernel(cls_ref, w1_ref, b1_ref, w2_ref, b2_ref, out_ref):
    """fc1 -> relu -> (dropout: identity at eval) -> fc2 -> log_softmax(dim=1).

    cls_ref: [TB, 768] bf16    w1_ref: [768, 512] bf16   b1_ref: [1, 512] f32
    w2_ref:  [512, 128] bf16   b2_ref: [1, 128] f32      out_ref: [TB, 128] f32
    """
    x = cls_ref[...]                                                      # bf16 [TB, 768]
    # fc1 on the MXU, f32 accumulation.
    h = jnp.dot(x, w1_ref[...], preferred_element_type=jnp.float32)      # f32 [TB, 512]
    h = h + b1_ref[...]
    h = jnp.maximum(h, 0.0)                                               # ReLU (f32)
    # nn.Dropout(0.1) is identity in eval mode.
    # fc2 on the MXU: bf16 operands, f32 accumulation.
    logits = jnp.dot(h.astype(jnp.bfloat16), w2_ref[...],
                     preferred_element_type=jnp.float32)                  # f32 [TB, 128]
    logits = logits + b2_ref[...]   # padded class columns carry bias = NEG_INF (f32)
    # numerically-stable log-softmax over the class axis (dim=1), all f32
    m = jnp.max(logits, axis=-1, keepdims=True)
    z = logits - m
    lse = jnp.log(jnp.sum(jnp.exp(z), axis=-1, keepdims=True))
    out_ref[...] = z - lse


@jax.jit
def bert_arch_head(cls_hs, w1_bf, b1, w2_bf, b2_pad):
    """Runs the fused classifier head on TPU via Pallas. Returns [B, SERVICES_COUNT] f32.

    cls_hs is expected in bf16 (the pooler emits bf16); w1_bf / w2_bf are bf16 weights
    prepared once in make_params.  Biases stay f32 (NEG_INF would saturate in bf16).
    """
    B = cls_hs.shape[0]

    # Tile selection: derive TB from the tile count so batch padding waste is < 16
    # rows per tile.  Force >= 2 tiles when B > 16 so v7x's 2nd TensorCore has work.
    n_tiles = pl.cdiv(B, TB_CAP)
    if B > 16:
        n_tiles = max(2, n_tiles)
    TB = _round_up(pl.cdiv(B, n_tiles), 16)   # multiple of 16 (bf16 sublane packing)
    B_pad = n_tiles * TB

    # No-op when cls_hs is already bf16 (the cast folds away under jit).
    x = cls_hs.astype(jnp.bfloat16)
    if B_pad != B:
        x = jnp.pad(x, ((0, B_pad - B), (0, 0)))

    cost = pl.CostEstimate(
        flops=2 * B_pad * (HIDDEN * FC1_OUT + FC1_OUT * C_PAD),
        transcendentals=B_pad * C_PAD,
        bytes_accessed=(x.size * 2 + w1_bf.size * 2 + w2_bf.size * 2
                        + b1.size * 4 + b2_pad.size * 4 + B_pad * C_PAD * 4),
    )

    out_pad = pl.pallas_call(
        _head_kernel,
        out_shape=jax.ShapeDtypeStruct((B_pad, C_PAD), jnp.float32),
        grid=(n_tiles,),
        in_specs=[
            pl.BlockSpec((TB, HIDDEN), lambda i: (i, 0)),        # cls_hs: tiled over batch
            pl.BlockSpec((HIDDEN, FC1_OUT), lambda i: (0, 0)),   # w1: VMEM-resident
            pl.BlockSpec((1, FC1_OUT), lambda i: (0, 0)),        # b1
            pl.BlockSpec((FC1_OUT, C_PAD), lambda i: (0, 0)),    # w2 (padded classes)
            pl.BlockSpec((1, C_PAD), lambda i: (0, 0)),          # b2 (padded classes)
        ],
        out_specs=pl.BlockSpec((TB, C_PAD), lambda i: (i, 0)),
        compiler_params=pltpu.CompilerParams(
            dimension_semantics=("parallel",),     # v7x: shard tiles across its 2 TCs
            vmem_limit_bytes=32 * 1024 * 1024,     # ample headroom; ~6 MiB actually used
        ),
        cost_estimate=cost,
    )(x, w1_bf, b1, w2_bf, b2_pad)

    # drop padded batch rows and padded (masked-out) class columns
    return out_pad[:B, :SERVICES_COUNT]


def make_params(key, vocab_size=100, services_count=SERVICES_COUNT):
    """Deterministic synthetic parameters (shapes follow BERT_Arch.__init__).

    bf16 copies of the matmul weights are prepared HERE (once), so the jitted head
    never pays per-call f32->bf16 cast traffic over the weight tensors.
    """
    k_emb, k_w1, k_b1, k_w2, k_b2 = jax.random.split(key, 5)
    emb = jax.random.normal(k_emb, (vocab_size, HIDDEN), jnp.float32) * 0.02

    w1 = jax.random.normal(k_w1, (HIDDEN, FC1_OUT), jnp.float32) * 0.02   # fc1: Linear(768, 512)
    b1 = jax.random.normal(k_b1, (1, FC1_OUT), jnp.float32) * 0.02

    w2 = jax.random.normal(k_w2, (FC1_OUT, services_count), jnp.float32) * 0.02  # fc2: Linear(512, C)
    b2 = jax.random.normal(k_b2, (1, services_count), jnp.float32) * 0.02

    # pad class dim to a full 128-lane tile; padded columns are forced to ~-inf
    # via the f32 bias so they contribute exp(.) == 0 to the log-softmax denominator.
    w2_pad = jnp.zeros((FC1_OUT, C_PAD), jnp.float32).at[:, :services_count].set(w2)
    b2_pad = jnp.full((1, C_PAD), NEG_INF, jnp.float32).at[:, :services_count].set(b2)

    # one-time bf16 weight copies for the kernel (MXU operands)
    w1_bf16 = w1.astype(jnp.bfloat16)
    w2_pad_bf16 = w2_pad.astype(jnp.bfloat16)

    return dict(emb=emb, w1=w1, b1=b1, w2=w2, b2=b2,
                w2_pad=w2_pad, b2_pad=b2_pad,
                w1_bf16=w1_bf16, w2_pad_bf16=w2_pad_bf16)


def proxy_bert_pooled_output(params, sent_id, mask):
    """Stand-in for self.bert(sent_id, attention_mask=mask)[1] (pooled CLS output).
    Deterministic embedding lookup + masked mean + tanh, plain-JAX glue.
    Emits bf16 so the head kernel reads its activations without an extra cast pass."""
    # TODO(synk): full rubert-base transformer encoder not implemented.
    tok = params["emb"][sent_id]                              # [B, S, 768]
    m = mask.astype(jnp.float32)[:, :, None]                  # [B, S, 1]
    pooled = jnp.sum(tok * m, axis=1) / jnp.maximum(jnp.sum(m, axis=1), 1.0)
    return jnp.tanh(pooled).astype(jnp.bfloat16)              # bf16 [B, 768]


def reference_head_bf16(params, cls_hs):
    """Pure-JAX reference with the same bf16-operand / f32-accumulate recipe."""
    x = cls_hs.astype(jnp.bfloat16)
    h = jnp.dot(x, params["w1_bf16"],
                preferred_element_type=jnp.float32) + params["b1"]
    h = jnp.maximum(h, 0.0)
    logits = jnp.dot(h.astype(jnp.bfloat16), params["w2"].astype(jnp.bfloat16),
                     preferred_element_type=jnp.float32) + params["b2"]
    return jax.nn.log_softmax(logits, axis=1)


def reference_head_f32(params, cls_hs):
    """Full-precision f32 reference (loose check against bf16 quantization)."""
    x = cls_hs.astype(jnp.float32)
    h = jnp.maximum(x @ params["w1"] + params["b1"], 0.0)
    logits = h @ params["w2"] + params["b2"]
    return jax.nn.log_softmax(logits, axis=1)


if __name__ == "__main__":
    key = jax.random.PRNGKey(0)
    k_params, k_ids = jax.random.split(key)

    B, S, VOCAB = 2, 8, 100
    params = make_params(k_params, vocab_size=VOCAB, services_count=SERVICES_COUNT)

    sent_id = jax.random.randint(k_ids, (B, S), 0, VOCAB, dtype=jnp.int32)
    mask = jnp.ones((B, S), dtype=jnp.int32).at[1, 5:].set(0)  # second sequence padded

    cls_hs = proxy_bert_pooled_output(params, sent_id, mask)   # [B, 768] bf16

    out = bert_arch_head(cls_hs, params["w1_bf16"], params["b1"],
                         params["w2_pad_bf16"], params["b2_pad"])
    out = jax.block_until_ready(out)

    assert out.shape == (B, SERVICES_COUNT), out.shape

    ref_bf16 = reference_head_bf16(params, cls_hs)
    ref_f32 = reference_head_f32(params, cls_hs)
    assert jnp.allclose(out, ref_bf16, atol=2e-3, rtol=2e-3), (out, ref_bf16)
    assert jnp.allclose(out, ref_f32, atol=5e-2, rtol=5e-2), (out, ref_f32)
    # log-softmax rows should exponentiate-and-sum to 1
    assert jnp.allclose(jnp.sum(jnp.exp(out), axis=1), 1.0, atol=1e-3)

    print("KERNEL_OK")
</pallas_src>

<mosaic_0001>
module attributes {stable_mosaic.version = 11 : i64} {
  func.func @_head_kernel(%arg0: i32, %arg1: memref<16x768xbf16, #tpu.memory_space<vmem>>, %arg2: memref<768x512xbf16, #tpu.memory_space<vmem>>, %arg3: memref<1x512xf32, #tpu.memory_space<vmem>>, %arg4: memref<512x128xbf16, #tpu.memory_space<vmem>>, %arg5: memref<1x128xf32, #tpu.memory_space<vmem>>, %arg6: memref<16x128xf32, #tpu.memory_space<vmem>>) attributes {dimension_semantics = [#tpu.dimension_semantics<parallel>], iteration_bounds = array<i64: 1>, scalar_prefetch = 0 : i64, scratch_operands = 0 : i64, tpu.core_type = #tpu.core_type<tc>, window_params = [{transform_indices = @transform_0, window_bounds = array<i64: 16, 768>}, {pipeline_mode = #tpu.pipeline_mode<synchronous>, transform_indices = @transform_1, window_bounds = array<i64: 768, 512>}, {pipeline_mode = #tpu.pipeline_mode<synchronous>, transform_indices = @transform_2, window_bounds = array<i64: 1, 512>}, {pipeline_mode = #tpu.pipeline_mode<synchronous>, transform_indices = @transform_3, window_bounds = array<i64: 512, 128>}, {pipeline_mode = #tpu.pipeline_mode<synchronous>, transform_indices = @transform_4, window_bounds = array<i64: 1, 128>}, {transform_indices = @transform_5, window_bounds = array<i64: 16, 128>}]} {
    %c0 = arith.constant 0 : index
    %c0_0 = arith.constant 0 : index
    %0 = vector.load %arg1[%c0, %c0_0] : memref<16x768xbf16, #tpu.memory_space<vmem>>, vector<16x768xbf16>
    %c0_1 = arith.constant 0 : index
    %c0_2 = arith.constant 0 : index
    %1 = vector.load %arg2[%c0_1, %c0_2] : memref<768x512xbf16, #tpu.memory_space<vmem>>, vector<768x512xbf16>
    %cst = arith.constant dense<0.000000e+00> : vector<16x512xf32>
    %2 = tpu.matmul %0, %1, %cst {dimension_numbers = #tpu.dot_dimension_numbers<[1], [0], [0], [1], [0, 0, 1, 1], [], []>} : vector<16x768xbf16>, vector<768x512xbf16>, vector<16x512xf32> -> vector<16x512xf32>
    %c0_3 = arith.constant 0 : index
    %c0_4 = arith.constant 0 : index
    %3 = vector.load %arg3[%c0_3, %c0_4] : memref<1x512xf32, #tpu.memory_space<vmem>>, vector<1x512xf32>
    %4 = vector.broadcast %3 : vector<1x512xf32> to vector<16x512xf32>
    %5 = arith.addf %2, %4 : vector<16x512xf32>
    %cst_5 = arith.constant 0.000000e+00 : f32
    %6 = vector.broadcast %cst_5 : f32 to vector<16x512xf32>
    %7 = arith.maximumf %5, %6 : vector<16x512xf32>
    %8 = arith.truncf %7 : vector<16x512xf32> to vector<16x512xbf16>
    %c0_6 = arith.constant 0 : index
    %c0_7 = arith.constant 0 : index
    %9 = vector.load %arg4[%c0_6, %c0_7] : memref<512x128xbf16, #tpu.memory_space<vmem>>, vector<512x128xbf16>
    %cst_8 = arith.constant dense<0.000000e+00> : vector<16x128xf32>
    %10 = tpu.matmul %8, %9, %cst_8 {dimension_numbers = #tpu.dot_dimension_numbers<[1], [0], [0], [1], [0, 0, 1, 1], [], []>} : vector<16x512xbf16>, vector<512x128xbf16>, vector<16x128xf32> -> vector<16x128xf32>
    %c0_9 = arith.constant 0 : index
    %c0_10 = arith.constant 0 : index
    %11 = vector.load %arg5[%c0_9, %c0_10] : memref<1x128xf32, #tpu.memory_space<vmem>>, vector<1x128xf32>
    %12 = vector.broadcast %11 : vector<1x128xf32> to vector<16x128xf32>
    %13 = arith.addf %10, %12 : vector<16x128xf32>
    %cst_11 = arith.constant dense<0xFF800000> : vector<16xf32>
    %14 = vector.multi_reduction <maximumf>, %13, %cst_11 [1] : vector<16x128xf32> to vector<16xf32>
    %15 = vector.shape_cast %14 : vector<16xf32> to vector<16x1xf32>
    %16 = vector.broadcast %15 : vector<16x1xf32> to vector<16x128xf32>
    %17 = arith.subf %13, %16 : vector<16x128xf32>
    %18 = math.exp %17 : vector<16x128xf32>
    %cst_12 = arith.constant dense<0.000000e+00> : vector<16xf32>
    %19 = vector.multi_reduction <add>, %18, %cst_12 [1] : vector<16x128xf32> to vector<16xf32>
    %20 = vector.shape_cast %19 : vector<16xf32> to vector<16x1xf32>
    %21 = math.log %20 : vector<16x1xf32>
    %22 = vector.broadcast %21 : vector<16x1xf32> to vector<16x128xf32>
    %23 = arith.subf %17, %22 : vector<16x128xf32>
    %c0_13 = arith.constant 0 : index
    %c0_14 = arith.constant 0 : index
    %24 = vector.load %arg6[%c0_13, %c0_14] : memref<16x128xf32, #tpu.memory_space<vmem>>, vector<16x128xf32>
    tpu.vector_store %arg6[%c0_13, %c0_14], %23 {strides = array<i32>} : memref<16x128xf32, #tpu.memory_space<vmem>>, vector<16x128xf32>,
    return
  }
  func.func @transform_0(%arg0: i32) -> (i32, i32) {
    %c0_i32 = arith.constant 0 : i32
    %c0_i32_0 = arith.constant 0 : i32
    return %arg0, %c0_i32 : i32, i32
  }
  func.func @transform_1(%arg0: i32) -> (i32, i32) {
    %c0_i32 = arith.constant 0 : i32
    %c0_i32_0 = arith.constant 0 : i32
    %c0_i32_1 = arith.constant 0 : i32
    return %c0_i32, %c0_i32_0 : i32, i32
  }
  func.func @transform_2(%arg0: i32) -> (i32, i32) {
    %c0_i32 = arith.constant 0 : i32
    %c0_i32_0 = arith.constant 0 : i32
    %c0_i32_1 = arith.constant 0 : i32
    return %c0_i32, %c0_i32_0 : i32, i32
  }
  func.func @transform_3(%arg0: i32) -> (i32, i32) {
    %c0_i32 = arith.constant 0 : i32
    %c0_i32_0 = arith.constant 0 : i32
    %c0_i32_1 = arith.constant 0 : i32
    return %c0_i32, %c0_i32_0 : i32, i32
  }
  func.func @transform_4(%arg0: i32) -> (i32, i32) {
    %c0_i32 = arith.constant 0 : i32
    %c0_i32_0 = arith.constant 0 : i32
    %c0_i32_1 = arith.constant 0 : i32
    return %c0_i32, %c0_i32_0 : i32, i32
  }
  func.func @transform_5(%arg0: i32) -> (i32, i32) {
    %c0_i32 = arith.constant 0 : i32
    %c0_i32_0 = arith.constant 0 : i32
    return %arg0, %c0_i32 : i32, i32
  }
}

</mosaic_0001>

<bundles_post_ra>
// kernel: bert_arch_head.1
= control target key start
LH: loop header
LB: loop body
LE: loop exit
PB: predicated region body
PF: predicated region fallthrough
CT: control target
= control target key end

     0   :  { %10 = vsyncpa [#allocation3], 0  ;;  %s3291_s0 = inlined_call_operand.vmem [shape: bf16[16,768], index: 0, kind: input, shape index: {}]   ;;  %s3292_s1 = inlined_call_operand.hbm [shape: bf16[768,512], index: 1, kind: input, shape index: {}]   ;;  %s3293_s2 = inlined_call_operand.vmem [shape: f32[1,512], index: 2, kind: input, shape index: {}]   ;;  %s3294_s3 = inlined_call_operand.hbm [shape: bf16[512,128], index: 3, kind: input, shape index: {}]   ;;  %s3295_s4 = inlined_call_operand.vmem [shape: f32[1,128], index: 4, kind: input, shape index: {}]   ;;  %s3296_s5 = inlined_call_operand.vmem [shape: f32[16,128], index: 5, kind: output, shape index: {}]  }
   0x1   :  { %s18_s20 = sshll.u32 %s3292_s1, 4  ;;  %s19_s20 = int_to_ptr.hbm [resolvable:$true] %s18_s20 }
   0x2   :  { %11 = vsyncpa [#allocation5], 0  ;;  %s3159_s21 = smov [#allocation2]   ;;  %s33_s25 = sshll.u32 %s3294_s3, 4  ;;  %s34_s25 = int_to_ptr.hbm [resolvable:$true] %s33_s25 }
   0x3   :  { %s20_s22 = sshll.u32 %s3159_s21, 4  ;;  %s3160_s26 = smov 256   ;;  %s21_s22 = int_to_ptr.vmem [resolvable:$true] %s20_s22 }
   0x4   :  { %s3161_s27 = smov 16   ;;  %s3162_s28 = smov [#allocation4]  }
   0x5   :  { %26 = dma.hbm_to_vmem [thread:$0]  %s19_s20, 24576, %s21_s22, [#allocation3], %s3160_s26, %s3160_s26, %s3161_s27  }
   0x6   :  { %s35_s29 = sshll.u32 %s3162_s28, 4  ;;  %s3163_s30 = smov 64   ;;  %s36_s29 = int_to_ptr.vmem [resolvable:$true] %s35_s29 }
   0x7   :  { %s3164_s6 = smov 4  }
   0x8   :  { %41 = dma.hbm_to_vmem [thread:$0]  %s34_s25, 4096, %s36_s29, [#allocation5], %s3163_s30, %s3163_s30, %s3164_s6  }
   0x9   :  { %3155 = dma.done.wait [#allocation3], 24576  }
   0xa   :  { %3156 = vsyncadd [#allocation3], 4294942720 }
   0xb   :  { %3157 = dma.done.wait [#allocation5], 4096  }
   0xc   :  { %3158 = vsyncadd [#allocation5], 4294963200  ;;  %v2080_v0 = vld [vmem:[#allocation2 + $0xe0] sm:$0xf]  ;;  %v2898_v1 = vld [vmem:[#allocation2 + $0xec] sm:$0xf0] }
   0xd   :  { %v2208_v2 = vld [vmem:[#allocation2 + $0x1e0] sm:$0xf]  ;;  %v2081_v3 = vor.u32 %v2898_v1, %v2080_v0  ;;  %v2930_v4 = vld [vmem:[#allocation2 + $0x1ec] sm:$0xf0] }
   0xe   :  { %v2336_v5 = vld [vmem:[#allocation2 + $0x2e0] sm:$0xf]  ;;  %v2962_v6 = vld [vmem:[#allocation2 + $0x2ec] sm:$0xf0]  ;;  %v2209_v7 = vor.u32 %v2930_v4, %v2208_v2 }
   0xf   :  { %v2337_v8 = vor.u32 %v2962_v6, %v2336_v5  ;;  %v2464_v9 = vld [vmem:[#allocation2 + $0x3e0] sm:$0xf]  ;;  %v2994_v10 = vld [vmem:[#allocation2 + $0x3ec] sm:$0xf0]  ;;  %1250 = vmatpush.bf16.msra.mxu0 %v2081_v3 }
  0x10   :  { %v2064_v11 = vld [vmem:[#allocation2 + $0xc0] sm:$0xf]  ;;  %v2465_v12 = vor.u32 %v2994_v10, %v2464_v9  ;;  %v2894_v13 = vld [vmem:[#allocation2 + $0xcc] sm:$0xf0]  ;;  %1264 = vmatpush.bf16.msra.mxu1 %v2209_v7 }
  0x11   :  { %v2192_v14 = vld [vmem:[#allocation2 + $0x1c0] sm:$0xf]  ;;  %v2926_v15 = vld [vmem:[#allocation2 + $0x1cc] sm:$0xf0]  ;;  %1278 = vmatpush.bf16.msra.mxu2 %v2337_v8  ;;  %v2065_v16 = vor.u32 %v2894_v13, %v2064_v11 }
  0x12   :  { %v2193_v17 = vor.u32 %v2926_v15, %v2192_v14  ;;  %v2320_v18 = vld [vmem:[#allocation2 + $0x2c0] sm:$0xf]  ;;  %v2958_v19 = vld [vmem:[#allocation2 + $0x2cc] sm:$0xf0]  ;;  %1292 = vmatpush.bf16.msra.mxu3 %v2465_v12 }
  0x13   :  { %v2448_v20 = vld [vmem:[#allocation2 + $0x3c0] sm:$0xf]  ;;  %v2321_v21 = vor.u32 %v2958_v19, %v2320_v18  ;;  %v2990_v22 = vld [vmem:[#allocation2 + $0x3cc] sm:$0xf0]  ;;  %1251 = vmatpush.bf16.msra.mxu0 %v2065_v16 }
  0x14   :  { %v2048_v23 = vld [vmem:[#allocation2 + $0xa0] sm:$0xf]  ;;  %v2890_v24 = vld [vmem:[#allocation2 + $0xac] sm:$0xf0]  ;;  %v2449_v25 = vor.u32 %v2990_v22, %v2448_v20  ;;  %1265 = vmatpush.bf16.msra.mxu1 %v2193_v17 }
  0x15   :  { %v2176_v26 = vld [vmem:[#allocation2 + $0x1a0] sm:$0xf]  ;;  %v2922_v27 = vld [vmem:[#allocation2 + $0x1ac] sm:$0xf0]  ;;  %v2049_v29 = vor.u32 %v2890_v24, %v2048_v23  ;;  %1279 = vmatpush.bf16.msra.mxu2 %v2321_v21 }
  0x16   :  { %v2304_v28 = vld [vmem:[#allocation2 + $0x2a0] sm:$0xf]  ;;  %v2954_v30 = vld [vmem:[#allocation2 + $0x2ac] sm:$0xf0]  ;;  %v2177_v33 = vor.u32 %v2922_v27, %v2176_v26  ;;  %1293 = vmatpush.bf16.msra.mxu3 %v2449_v25 }
  0x17   :  { %v2432_v31 = vld [vmem:[#allocation2 + $0x3a0] sm:$0xf]  ;;  %v2986_v32 = vld [vmem:[#allocation2 + $0x3ac] sm:$0xf0]  ;;  %v2305_v34 = vor.u32 %v2954_v30, %v2304_v28  ;;  %1252 = vmatpush.bf16.msra.mxu0 %v2049_v29 }
  0x18   :  { %v2032_v35 = vld [vmem:[#allocation2 + $0x80] sm:$0xf]  ;;  %v2886_v36 = vld [vmem:[#allocation2 + $0x8c] sm:$0xf0]  ;;  %v2433_v38 = vor.u32 %v2986_v32, %v2432_v31  ;;  %1266 = vmatpush.bf16.msra.mxu1 %v2177_v33  ;;  %v2896_v33 = vld [vmem:[#allocation2 + $0xe4] sm:$0xf] }
  0x19   :  { %v2160_v37 = vld [vmem:[#allocation2 + $0x180] sm:$0xf]  ;;  %v2918_v39 = vld [vmem:[#allocation2 + $0x18c] sm:$0xf0]  ;;  %v2033_v44 = vor.u32 %v2886_v36, %v2032_v35  ;;  %1280 = vmatpush.bf16.msra.mxu2 %v2305_v34  ;;  %v2082_v34 = vld [vmem:[#allocation2 + $0xf0] sm:$0xf0] }
  0x1a   :  { %v2288_v40 = vld [vmem:[#allocation2 + $0x280] sm:$0xf]  ;;  %v2950_v41 = vld [vmem:[#allocation2 + $0x28c] sm:$0xf0]  ;;  %v2161_v45 = vor.u32 %v2918_v39, %v2160_v37  ;;  %1294 = vmatpush.bf16.msra.mxu3 %v2433_v38  ;;  %v2928_v37 = vld [vmem:[#allocation2 + $0x1e4] sm:$0xf] }
  0x1b   :  { %v2416_v42 = vld [vmem:[#allocation2 + $0x380] sm:$0xf]  ;;  %v2982_v43 = vld [vmem:[#allocation2 + $0x38c] sm:$0xf0]  ;;  %v2289_v46 = vor.u32 %v2950_v41, %v2288_v40  ;;  %1253 = vmatpush.bf16.msra.mxu0 %v2033_v44  ;;  %v2210_v38 = vld [vmem:[#allocation2 + $0x1f0] sm:$0xf0] }
  0x1c   :  { %v2016_v47 = vld [vmem:[#allocation2 + $0x60] sm:$0xf]  ;;  %v2882_v48 = vld [vmem:[#allocation2 + $0x6c] sm:$0xf0]  ;;  %v2417_v50 = vor.u32 %v2982_v43, %v2416_v42  ;;  %1267 = vmatpush.bf16.msra.mxu1 %v2161_v45  ;;  %v2085_v43 = vor.u32 %v2896_v33, %v2082_v34  ;;  %v2018_v33 = vld [vmem:[#allocation2 + $0x70] sm:$0xf0] }
  0x1d   :  { %v2144_v49 = vld [vmem:[#allocation2 + $0x160] sm:$0xf]  ;;  %v2914_v51 = vld [vmem:[#allocation2 + $0x16c] sm:$0xf0]  ;;  %v2017_v56 = vor.u32 %v2882_v48, %v2016_v47  ;;  %1281 = vmatpush.bf16.msra.mxu2 %v2289_v46  ;;  %v2213_v47 = vor.u32 %v2928_v37, %v2210_v38  ;;  %v2892_v48 = vld [vmem:[#allocation2 + $0xc4] sm:$0xf] }
  0x1e   :  { %v2272_v52 = vld [vmem:[#allocation2 + $0x260] sm:$0xf]  ;;  %v2946_v53 = vld [vmem:[#allocation2 + $0x26c] sm:$0xf0]  ;;  %v2145_v57 = vor.u32 %v2914_v51, %v2144_v49  ;;  %1295 = vmatpush.bf16.msra.mxu3 %v2417_v50  ;;  %v2066_v49 = vld [vmem:[#allocation2 + $0xd0] sm:$0xf0] }
  0x1f   :  { %v2400_v54 = vld [vmem:[#allocation2 + $0x360] sm:$0xf]  ;;  %v2978_v55 = vld [vmem:[#allocation2 + $0x36c] sm:$0xf0]  ;;  %v2273_v58 = vor.u32 %v2946_v53, %v2272_v52  ;;  %1254 = vmatpush.bf16.msra.mxu0 %v2017_v56  ;;  %v2924_v50 = vld [vmem:[#allocation2 + $0x1c4] sm:$0xf] }
  0x20   :  { %v2000_v59 = vld [vmem:[#allocation2 + $0x40] sm:$0xf]  ;;  %v2878_v60 = vld [vmem:[#allocation2 + $0x4c] sm:$0xf0]  ;;  %v2401_v62 = vor.u32 %v2978_v55, %v2400_v54  ;;  %1268 = vmatpush.bf16.msra.mxu1 %v2145_v57  ;;  %v2194_v51 = vld [vmem:[#allocation2 + $0x1d0] sm:$0xf0] }
  0x21   :  { %v2128_v61 = vld [vmem:[#allocation2 + $0x140] sm:$0xf]  ;;  %v2910_v63 = vld [vmem:[#allocation2 + $0x14c] sm:$0xf0]  ;;  %v2001_v4 = vor.u32 %v2878_v60, %v2000_v59  ;;  %1282 = vmatpush.bf16.msra.mxu2 %v2273_v58  ;;  %v2865_v53 = vld [vmem:[%s3291_s0 + $0x14] sm:$0xf0]  ;;  %v2069_v59 = vor.u32 %v2892_v48, %v2066_v49 }
  0x22   :  { %v2256_v0 = vld [vmem:[#allocation2 + $0x240] sm:$0xf]  ;;  %v2942_v1 = vld [vmem:[#allocation2 + $0x24c] sm:$0xf0]  ;;  %v2129_v5 = vor.u32 %v2910_v63, %v2128_v61  ;;  %1296 = vmatpush.bf16.msra.mxu3 %v2401_v62  ;;  %v2888_v62 = vld [vmem:[#allocation2 + $0xa4] sm:$0xf]  ;;  %v2197_v63 = vor.u32 %v2924_v50, %v2194_v51 }
  0x23   :  { %v2384_v2 = vld [vmem:[#allocation2 + $0x340] sm:$0xf]  ;;  %v2974_v3 = vld [vmem:[#allocation2 + $0x34c] sm:$0xf0]  ;;  %v2257_v6 = vor.u32 %v2942_v1, %v2256_v0  ;;  %1255 = vmatpush.bf16.msra.mxu0 %v2001_v4  ;;  %v2050_v0 = vld [vmem:[#allocation2 + $0xb0] sm:$0xf0] }
  0x24   :  { %v1984_v7 = vld [vmem:[#allocation2 + $0x20] sm:$0xf]  ;;  %v2874_v8 = vld [vmem:[#allocation2 + $0x2c] sm:$0xf0]  ;;  %v2385_v10 = vor.u32 %v2974_v3, %v2384_v2  ;;  %1269 = vmatpush.bf16.msra.mxu1 %v2129_v5  ;;  %v2862_v1 = vld [vmem:[%s3291_s0 + $0x4] sm:$0xf] }
  0x25   :  { %v2112_v9 = vld [vmem:[#allocation2 + $0x120] sm:$0xf]  ;;  %v2906_v11 = vld [vmem:[#allocation2 + $0x12c] sm:$0xf0]  ;;  %v1985_v16 = vor.u32 %v2874_v8, %v1984_v7  ;;  %1283 = vmatpush.bf16.msra.mxu2 %v2257_v6  ;;  %v1946_v2 = vld [vmem:[%s3291_s0 + $0x18] sm:$0xf0] }
  0x26   :  { %v2240_v12 = vld [vmem:[#allocation2 + $0x220] sm:$0xf]  ;;  %v2938_v13 = vld [vmem:[#allocation2 + $0x22c] sm:$0xf0]  ;;  %v2113_v19 = vor.u32 %v2906_v11, %v2112_v9  ;;  %1297 = vmatpush.bf16.msra.mxu3 %v2385_v10  ;;  %v2920_v3 = vld [vmem:[#allocation2 + $0x1a4] sm:$0xf]  ;;  %v3216_v6 = vor.u32 %v2862_v1, %v1946_v2 }
  0x27   :  { %v2368_v14 = vld [vmem:[#allocation2 + $0x320] sm:$0xf]  ;;  %v2970_v15 = vld [vmem:[#allocation2 + $0x32c] sm:$0xf0]  ;;  %v2241_v20 = vor.u32 %v2938_v13, %v2240_v12  ;;  %1256 = vmatpush.bf16.msra.mxu0 %v1985_v16  ;;  %v2178_v4 = vld [vmem:[#allocation2 + $0x1b0] sm:$0xf0]  ;;  %v2053_v12 = vor.u32 %v2888_v62, %v2050_v0 }
  0x28   :  { %v1968_v17 = vld [vmem:[#allocation2] sm:$0xf]  ;;  %v2870_v18 = vld [vmem:[#allocation2 + $0xc] sm:$0xf0]  ;;  %v2369_v24 = vor.u32 %v2970_v15, %v2368_v14  ;;  %1270 = vmatpush.bf16.msra.mxu1 %v2113_v19  ;;  %v2884_v13 = vld [vmem:[#allocation2 + $0x84] sm:$0xf]  ;;  %v2181_v16 = vor.u32 %v2920_v3, %v2178_v4 }
  0x29   :  { %v2096_v21 = vld [vmem:[#allocation2 + $0x100] sm:$0xf]  ;;  %v2902_v22 = vld [vmem:[#allocation2 + $0x10c] sm:$0xf0]  ;;  %v1969_v31 = vor.u32 %v2870_v18, %v1968_v17  ;;  %1284 = vmatpush.bf16.msra.mxu2 %v2241_v20  ;;  %v2034_v14 = vld [vmem:[#allocation2 + $0x90] sm:$0xf0] }
  0x2a   :  { %v2224_v23 = vld [vmem:[#allocation2 + $0x200] sm:$0xf]  ;;  %v2934_v25 = vld [vmem:[#allocation2 + $0x20c] sm:$0xf0]  ;;  %v2097_v35 = vor.u32 %v2902_v22, %v2096_v21  ;;  %1298 = vmatpush.bf16.msra.mxu3 %v2369_v24  ;;  %v1952_v15 = vld [vmem:[%s3291_s0 + $0x8] sm:$0xf] }
  0x2b   :  { %v2352_v26 = vld [vmem:[#allocation2 + $0x300] sm:$0xf]  ;;  %v2966_v27 = vld [vmem:[#allocation2 + $0x30c] sm:$0xf0]  ;;  %v2225_v36 = vor.u32 %v2934_v25, %v2224_v23  ;;  %1257 = vmatpush.bf16.msra.mxu0 %v1969_v31  ;;  %v2863_v18 = vld [vmem:[%s3291_s0 + $0xc] sm:$0xf] }
  0x2c   :  { %v2592_v28 = vld [vmem:[#allocation2 + $0x4e0] sm:$0xf]  ;;  %v3026_v29 = vld [vmem:[#allocation2 + $0x4ec] sm:$0xf0]  ;;  %v2353_v39 = vor.u32 %v2966_v27, %v2352_v26  ;;  %1271 = vmatpush.bf16.msra.mxu1 %v2097_v35  ;;  %v1954_v19 = vld [vmem:[%s3291_s0 + $0x20] sm:$0xf0]  ;;  %v2037_v26 = vor.u32 %v2884_v13, %v2034_v14 }
  0x2d   :  { %v2720_v30 = vld [vmem:[#allocation2 + $0x5e0] sm:$0xf]  ;;  %v3058_v32 = vld [vmem:[#allocation2 + $0x5ec] sm:$0xf0]  ;;  %v2593_v40 = vor.u32 %v3026_v29, %v2592_v28  ;;  %1285 = vmatpush.bf16.msra.mxu2 %v2225_v36  ;;  %v2916_v20 = vld [vmem:[#allocation2 + $0x184] sm:$0xf]  ;;  %v3233_v23 = vor.u32 %v2863_v18, %v1954_v19 }
  0x2e   :  { %v2576_v41 = vld [vmem:[#allocation2 + $0x4c0] sm:$0xf]  ;;  %v2721_v42 = vor.u32 %v3058_v32, %v2720_v30  ;;  %v3022_v44 = vld [vmem:[#allocation2 + $0x4cc] sm:$0xf0]  ;;  %1299 = vmatpush.bf16.msra.mxu3 %v2353_v39  ;;  %v2162_v21 = vld [vmem:[#allocation2 + $0x190] sm:$0xf0] }
  0x2f   :  { %v2704_v45 = vld [vmem:[#allocation2 + $0x5c0] sm:$0xf]  ;;  %v3054_v46 = vld [vmem:[#allocation2 + $0x5cc] sm:$0xf0]  ;;  %1306 = vmatpush.bf16.msrb.mxu0 %v2593_v40  ;;  %v2577_v54 = vor.u32 %v3022_v44, %v2576_v41  ;;  %1272 = vmatmul.bf16.vlgmr.msra.gmra.mxu1 %v3216_v6  ;;  %v2165_v30 = vor.u32 %v2916_v20, %v2162_v21  ;;  %v2880_v32 = vld [vmem:[#allocation2 + $0x64] sm:$0xf] }
  0x30   :  { %v1944_v52 = vld [vmem:[%s3291_s0] sm:$0xf]  ;;  %v3018_v56 = vld [vmem:[#allocation2 + $0x4ac] sm:$0xf0]  ;;  %1320 = vmatpush.bf16.msrb.mxu1 %v2721_v42  ;;  %v2705_v58 = vor.u32 %v3054_v46, %v2704_v45  ;;  %v2912_v34 = vld [vmem:[#allocation2 + $0x164] sm:$0xf]  ;;  %v2021_v38 = vor.u32 %v2880_v32, %v2018_v33 }
  0x31   :  { %v2560_v55 = vld [vmem:[#allocation2 + $0x4a0] sm:$0xf]  ;;  %v3207_v57 = vor.u32 %v2865_v53, %v1944_v52  ;;  %1334 = vmatpush.bf16.msrb.mxu2 %v2085_v43  ;;  %v3050_v61 = vld [vmem:[#allocation2 + $0x5ac] sm:$0xf0]  ;;  %v2146_v35 = vld [vmem:[#allocation2 + $0x170] sm:$0xf0]  ;;  %1300 = vmatmul.bf16.vlgmr.msra.gmra.mxu3 %v3233_v23 }
  0x32   :  { %v2688_v60 = vld [vmem:[#allocation2 + $0x5a0] sm:$0xf]  ;;  %1348 = vmatpush.bf16.msrb.mxu3 %v2213_v47  ;;  %v2561_v7 = vor.u32 %v3018_v56, %v2560_v55  ;;  %v3014_v8 = vld [vmem:[#allocation2 + $0x48c] sm:$0xf0]  ;;  %v2149_v42 = vor.u32 %v2912_v34, %v2146_v35  ;;  %v2876_v44 = vld [vmem:[#allocation2 + $0x44] sm:$0xf] }
  0x33   :  { %1258 = vmatmul.bf16.vlgmr.msra.gmra.mxu0 %v3207_v57  ;;  %v2544_v5 = vld [vmem:[#allocation2 + $0x480] sm:$0xf]  ;;  %v3046_v10 = vld [vmem:[#allocation2 + $0x58c] sm:$0xf0]  ;;  %v2689_v11 = vor.u32 %v3050_v61, %v2688_v60  ;;  %v2002_v45 = vld [vmem:[#allocation2 + $0x50] sm:$0xf0] }
  0x34   :  { %1307 = vmatpush.bf16.msrb.mxu0 %v2577_v54  ;;  %v2672_v9 = vld [vmem:[#allocation2 + $0x580] sm:$0xf]  ;;  %1321 = vmatpush.bf16.msrb.mxu1 %v2705_v58  ;;  %v2545_v24 = vor.u32 %v3014_v8, %v2544_v5  ;;  %v3010_v28 = vld [vmem:[#allocation2 + $0x46c] sm:$0xf0]  ;;  %v2908_v46 = vld [vmem:[#allocation2 + $0x144] sm:$0xf]  ;;  %v2005_v50 = vor.u32 %v2876_v44, %v2002_v45 }
  0x35   :  { %1335 = vmatpush.bf16.msrb.mxu2 %v2069_v59  ;;  %v2866_v17 = vld [vmem:[%s3291_s0 + $0x1c] sm:$0xf0]  ;;  %v2673_v25 = vor.u32 %v3046_v10, %v2672_v9  ;;  %v3042_v31 = vld [vmem:[#allocation2 + $0x56c] sm:$0xf0]  ;;  %v2130_v47 = vld [vmem:[#allocation2 + $0x150] sm:$0xf0] }
  0x36   :  { %1349 = vmatpush.bf16.msrb.mxu3 %v2197_v63  ;;  %v3231_v22 = vor.u32 %v2866_v17, %v1952_v15  ;;  %v2528_v27 = vld [vmem:[#allocation2 + $0x460] sm:$0xf]  ;;  %v3006_v40 = vld [vmem:[#allocation2 + $0x44c] sm:$0xf0]  ;;  %v2133_v54 = vor.u32 %v2908_v46, %v2130_v47  ;;  %v2872_v56 = vld [vmem:[#allocation2 + $0x24] sm:$0xf] }
  0x37   :  { %v2656_v29 = vld [vmem:[#allocation2 + $0x560] sm:$0xf]  ;;  %v2529_v36 = vor.u32 %v3010_v28, %v2528_v27  ;;  %v3038_v43 = vld [vmem:[#allocation2 + $0x54c] sm:$0xf0]  ;;  %v1986_v58 = vld [vmem:[#allocation2 + $0x30] sm:$0xf0] }
  0x38   :  { %1308 = vmatpush.bf16.msrb.mxu0 %v2561_v7  ;;  %1322 = vmatpush.bf16.msrb.mxu1 %v2689_v11  ;;  %v2657_v37 = vor.u32 %v3042_v31, %v2656_v29  ;;  %v2512_v39 = vld [vmem:[#allocation2 + $0x440] sm:$0xf]  ;;  %v3002_v52 = vld [vmem:[#allocation2 + $0x42c] sm:$0xf0]  ;;  %v2904_v59 = vld [vmem:[#allocation2 + $0x124] sm:$0xf]  ;;  %v1989_v2 = vor.u32 %v2872_v56, %v1986_v58 }
  0x39   :  { %1336 = vmatpush.bf16.msrb.mxu2 %v2053_v12  ;;  %v2640_v41 = vld [vmem:[#allocation2 + $0x540] sm:$0xf]  ;;  %v2513_v48 = vor.u32 %v3006_v40, %v2512_v39  ;;  %v3034_v55 = vld [vmem:[#allocation2 + $0x52c] sm:$0xf0]  ;;  %v2114_v60 = vld [vmem:[#allocation2 + $0x130] sm:$0xf0] }
  0x3a   :  { %1350 = vmatpush.bf16.msrb.mxu3 %v2181_v16  ;;  %1286 = vmatmul.bf16.vlgmr.msra.gmra.mxu2 %v3231_v22  ;;  %v2641_v49 = vor.u32 %v3038_v43, %v2640_v41  ;;  %v2496_v51 = vld [vmem:[#allocation2 + $0x420] sm:$0xf]  ;;  %v2998_v63 = vld [vmem:[#allocation2 + $0x40c] sm:$0xf0]  ;;  %v2868_v4 = vld [vmem:[#allocation2 + $0x4] sm:$0xf]  ;;  %v2117_v7 = vor.u32 %v2904_v59, %v2114_v60 }
  0x3b   :  { %v2624_v53 = vld [vmem:[#allocation2 + $0x520] sm:$0xf]  ;;  %v2497_v61 = vor.u32 %v3002_v52, %v2496_v51  ;;  %v3030_v3 = vld [vmem:[#allocation2 + $0x50c] sm:$0xf0]  ;;  %v1970_v5 = vld [vmem:[#allocation2 + $0x10] sm:$0xf0] }
  0x3c   :  { %1309 = vmatpush.bf16.msrb.mxu0 %v2545_v24  ;;  %1323 = vmatpush.bf16.msrb.mxu1 %v2673_v25  ;;  %v2480_v62 = vld [vmem:[#allocation2 + $0x400] sm:$0xf]  ;;  %v2625_v1 = vor.u32 %v3034_v55, %v2624_v53  ;;  %v2900_v8 = vld [vmem:[#allocation2 + $0x104] sm:$0xf]  ;;  %v2098_v9 = vld [vmem:[#allocation2 + $0x110] sm:$0xf0]  ;;  %v1973_v19 = vor.u32 %v2868_v4, %v1970_v5 }
  0x3d   :  { %1337 = vmatpush.bf16.msrb.mxu2 %v2037_v26  ;;  %v2608_v0 = vld [vmem:[#allocation2 + $0x500] sm:$0xf]  ;;  %v2960_v10 = vld [vmem:[#allocation2 + $0x2e4] sm:$0xf]  ;;  %v2338_v11 = vld [vmem:[#allocation2 + $0x2f0] sm:$0xf0]  ;;  %v2481_v14 = vor.u32 %v2998_v63, %v2480_v62  ;;  %v2101_v25 = vor.u32 %v2900_v8, %v2098_v9 }
  0x3e   :  { %1351 = vmatpush.bf16.msrb.mxu3 %v2165_v30  ;;  %v2992_v12 = vld [vmem:[#allocation2 + $0x3e4] sm:$0xf]  ;;  %v2466_v13 = vld [vmem:[#allocation2 + $0x3f0] sm:$0xf0]  ;;  %v2609_v18 = vor.u32 %v3030_v3, %v2608_v0  ;;  %v1960_v21 = vld [vmem:[%s3291_s0 + $0x10] sm:$0xf]  ;;  %v2341_v26 = vor.u32 %v2960_v10, %v2338_v11 }
  0x3f   :  { %v3024_v15 = vld [vmem:[#allocation2 + $0x4e4] sm:$0xf]  ;;  %v2594_v16 = vld [vmem:[#allocation2 + $0x4f0] sm:$0xf0]  ;;  %v2867_v24 = vld [vmem:[%s3291_s0 + $0x24] sm:$0xf0]  ;;  %v2469_v29 = vor.u32 %v2992_v12, %v2466_v13 }
  0x40   :  { %1310 = vmatpush.bf16.msrb.mxu0 %v2529_v36  ;;  %1324 = vmatpush.bf16.msrb.mxu1 %v2657_v37  ;;  %v3056_v17 = vld [vmem:[#allocation2 + $0x5e4] sm:$0xf]  ;;  %v2722_v20 = vld [vmem:[#allocation2 + $0x5f0] sm:$0xf0]  ;;  %v1962_v28 = vld [vmem:[%s3291_s0 + $0x28] sm:$0xf0]  ;;  %v2597_v30 = vor.u32 %v3024_v15, %v2594_v16  ;;  %v3249_v35 = vor.u32 %v2867_v24, %v1960_v21 }
  0x41   :  { %1338 = vmatpush.bf16.msrb.mxu2 %v2021_v38  ;;  %v2864_v27 = vld [vmem:[%s3291_s0 + $0x14] sm:$0xf]  ;;  %v2956_v31 = vld [vmem:[#allocation2 + $0x2c4] sm:$0xf]  ;;  %v2725_v34 = vor.u32 %v3056_v17, %v2722_v20 }
  0x42   :  { %1352 = vmatpush.bf16.msrb.mxu3 %v2149_v42  ;;  %v2322_v32 = vld [vmem:[#allocation2 + $0x2d0] sm:$0xf0]  ;;  %v2988_v33 = vld [vmem:[#allocation2 + $0x3c4] sm:$0xf]  ;;  %v3251_v39 = vor.u32 %v2864_v27, %v1962_v28 }
  0x43   :  { %v2450_v36 = vld [vmem:[#allocation2 + $0x3d0] sm:$0xf0]  ;;  %v3020_v37 = vld [vmem:[#allocation2 + $0x4c4] sm:$0xf]  ;;  %v2325_v42 = vor.u32 %v2956_v31, %v2322_v32 }
  0x44   :  { %1311 = vmatpush.bf16.msrb.mxu0 %v2513_v48  ;;  %1325 = vmatpush.bf16.msrb.mxu1 %v2641_v49  ;;  %v2578_v38 = vld [vmem:[#allocation2 + $0x4d0] sm:$0xf0]  ;;  %v3052_v40 = vld [vmem:[#allocation2 + $0x5c4] sm:$0xf]  ;;  %v2453_v43 = vor.u32 %v2988_v33, %v2450_v36 }
  0x45   :  { %1339 = vmatpush.bf16.msrb.mxu2 %v2005_v50  ;;  %v2706_v41 = vld [vmem:[#allocation2 + $0x5d0] sm:$0xf0]  ;;  %v2581_v44 = vor.u32 %v3020_v37, %v2578_v38  ;;  %v2952_v45 = vld [vmem:[#allocation2 + $0x2a4] sm:$0xf] }
  0x46   :  { %1353 = vmatpush.bf16.msrb.mxu3 %v2133_v54  ;;  %v2306_v46 = vld [vmem:[#allocation2 + $0x2b0] sm:$0xf0]  ;;  %v2984_v47 = vld [vmem:[#allocation2 + $0x3a4] sm:$0xf]  ;;  %v2709_v48 = vor.u32 %v3052_v40, %v2706_v41 }
  0x47   :  { %v2434_v49 = vld [vmem:[#allocation2 + $0x3b0] sm:$0xf0]  ;;  %v3016_v50 = vld [vmem:[#allocation2 + $0x4a4] sm:$0xf]  ;;  %v2309_v54 = vor.u32 %v2952_v45, %v2306_v46 }
  0x48   :  { %1312 = vmatpush.bf16.msrb.mxu0 %v2497_v61  ;;  %1326 = vmatpush.bf16.msrb.mxu1 %v2625_v1  ;;  %v2562_v51 = vld [vmem:[#allocation2 + $0x4b0] sm:$0xf0]  ;;  %v3048_v52 = vld [vmem:[#allocation2 + $0x5a4] sm:$0xf]  ;;  %v2437_v55 = vor.u32 %v2984_v47, %v2434_v49 }
  0x49   :  { %1340 = vmatpush.bf16.msrb.mxu2 %v1989_v2  ;;  %v2690_v53 = vld [vmem:[#allocation2 + $0x5b0] sm:$0xf0]  ;;  %v2565_v56 = vor.u32 %v3016_v50, %v2562_v51  ;;  %v2948_v58 = vld [vmem:[#allocation2 + $0x284] sm:$0xf] }
  0x4a   :  { %1354 = vmatpush.bf16.msrb.mxu3 %v2117_v7  ;;  %v2290_v59 = vld [vmem:[#allocation2 + $0x290] sm:$0xf0]  ;;  %v2980_v60 = vld [vmem:[#allocation2 + $0x384] sm:$0xf]  ;;  %v2693_v61 = vor.u32 %v3048_v52, %v2690_v53 }
  0x4b   :  { %v2418_v62 = vld [vmem:[#allocation2 + $0x390] sm:$0xf0]  ;;  %v3012_v63 = vld [vmem:[#allocation2 + $0x484] sm:$0xf]  ;;  %v2293_v3 = vor.u32 %v2948_v58, %v2290_v59  ;;  %v2899_v58 = vld [vmem:[#allocation2 + $0xf4] sm:$0xf0] }
  0x4c   :  { %1313 = vmatpush.bf16.msrb.mxu0 %v2481_v14  ;;  %1327 = vmatpush.bf16.msrb.mxu1 %v2609_v18  ;;  %v2546_v0 = vld [vmem:[#allocation2 + $0x490] sm:$0xf0]  ;;  %v3044_v1 = vld [vmem:[#allocation2 + $0x584] sm:$0xf]  ;;  %v2421_v4 = vor.u32 %v2980_v60, %v2418_v62  ;;  %v2216_v59 = vld [vmem:[#allocation2 + $0x1e8] sm:$0xf] }
  0x4d   :  { %1341 = vmatpush.bf16.msrb.mxu2 %v1973_v19  ;;  %v2674_v2 = vld [vmem:[#allocation2 + $0x590] sm:$0xf0]  ;;  %v2549_v5 = vor.u32 %v3012_v63, %v2546_v0  ;;  %v2944_v7 = vld [vmem:[#allocation2 + $0x264] sm:$0xf]  ;;  %v2344_v62 = vld [vmem:[#allocation2 + $0x2e8] sm:$0xf] }
  0x4e   :  { %1355 = vmatpush.bf16.msrb.mxu3 %v2101_v25  ;;  %v2274_v8 = vld [vmem:[#allocation2 + $0x270] sm:$0xf0]  ;;  %v2976_v9 = vld [vmem:[#allocation2 + $0x364] sm:$0xf]  ;;  %v2677_v10 = vor.u32 %v3044_v1, %v2674_v2  ;;  %v2963_v63 = vld [vmem:[#allocation2 + $0x2f4] sm:$0xf0] }
  0x4f   :  { %1314 = vmatmul.bf16.vlgmr.msrb.gmra.mxu0 %v3249_v35  ;;  %1328 = vmatmul.bf16.vlgmr.msrb.gmra.mxu1 %v3251_v39  ;;  %v2402_v11 = vld [vmem:[#allocation2 + $0x370] sm:$0xf0]  ;;  %v3008_v12 = vld [vmem:[#allocation2 + $0x464] sm:$0xf]  ;;  %v2277_v16 = vor.u32 %v2944_v7, %v2274_v8  ;;  %v2472_v2 = vld [vmem:[#allocation2 + $0x3e8] sm:$0xf]  ;;  %v2345_v8 = vor.u32 %v2963_v63, %v2344_v62 }
  0x50   :  { %1362 = vmatpush.bf16.msra.mxu0 %v2341_v26  ;;  %1376 = vmatpush.bf16.msra.mxu1 %v2469_v29  ;;  %v2530_v13 = vld [vmem:[#allocation2 + $0x470] sm:$0xf0]  ;;  %v3040_v14 = vld [vmem:[#allocation2 + $0x564] sm:$0xf]  ;;  %v2405_v17 = vor.u32 %v2976_v9, %v2402_v11  ;;  %v2072_v9 = vld [vmem:[#allocation2 + $0xc8] sm:$0xf] }
  0x51   :  { %1390 = vmatpush.bf16.msra.mxu2 %v2597_v30  ;;  %1356 = vmatmul.bf16.vlgmr.msrb.gmra.mxu3 %v3216_v6  ;;  %v2658_v15 = vld [vmem:[#allocation2 + $0x570] sm:$0xf0]  ;;  %v2533_v18 = vor.u32 %v3008_v12, %v2530_v13  ;;  %v2940_v19 = vld [vmem:[#allocation2 + $0x244] sm:$0xf]  ;;  %v2200_v11 = vld [vmem:[#allocation2 + $0x1c8] sm:$0xf] }
  0x52   :  { %1404 = vmatpush.bf16.msra.mxu3 %v2725_v34  ;;  %1342 = vmatmul.bf16.vlgmr.msrb.gmra.mxu2 %v3207_v57  ;;  %v2258_v20 = vld [vmem:[#allocation2 + $0x250] sm:$0xf0]  ;;  %v2972_v21 = vld [vmem:[#allocation2 + $0x344] sm:$0xf]  ;;  %v2661_v24 = vor.u32 %v3040_v14, %v2658_v15  ;;  %v2927_v13 = vld [vmem:[#allocation2 + $0x1d4] sm:$0xf0] }
  0x53   :  { %v2386_v25 = vld [vmem:[#allocation2 + $0x350] sm:$0xf0]  ;;  %v3004_v26 = vld [vmem:[#allocation2 + $0x444] sm:$0xf]  ;;  %v2261_v30 = vor.u32 %v2940_v19, %v2258_v20  ;;  %v2328_v14 = vld [vmem:[#allocation2 + $0x2c8] sm:$0xf]  ;;  %v2201_v19 = vor.u32 %v2927_v13, %v2200_v11 }
  0x54   :  { %1363 = vmatpush.bf16.msra.mxu0 %v2325_v42  ;;  %1377 = vmatpush.bf16.msra.mxu1 %v2453_v43  ;;  %v2514_v27 = vld [vmem:[#allocation2 + $0x450] sm:$0xf0]  ;;  %v3036_v28 = vld [vmem:[#allocation2 + $0x544] sm:$0xf]  ;;  %v2389_v31 = vor.u32 %v2972_v21, %v2386_v25  ;;  %v2959_v15 = vld [vmem:[#allocation2 + $0x2d4] sm:$0xf0] }
  0x55   :  { %1391 = vmatpush.bf16.msra.mxu2 %v2581_v44  ;;  %v2642_v29 = vld [vmem:[#allocation2 + $0x550] sm:$0xf0]  ;;  %v2517_v32 = vor.u32 %v3004_v26, %v2514_v27  ;;  %v2936_v33 = vld [vmem:[#allocation2 + $0x224] sm:$0xf]  ;;  %v2329_v20 = vor.u32 %v2959_v15, %v2328_v14  ;;  %v2056_v21 = vld [vmem:[#allocation2 + $0xa8] sm:$0xf] }
  0x56   :  { %1405 = vmatpush.bf16.msra.mxu3 %v2709_v48  ;;  %v2242_v34 = vld [vmem:[#allocation2 + $0x230] sm:$0xf0]  ;;  %v2968_v36 = vld [vmem:[#allocation2 + $0x324] sm:$0xf]  ;;  %v2645_v37 = vor.u32 %v3036_v28, %v2642_v29  ;;  %v2184_v25 = vld [vmem:[#allocation2 + $0x1a8] sm:$0xf] }
  0x57   :  { %v2370_v38 = vld [vmem:[#allocation2 + $0x330] sm:$0xf0]  ;;  %v3000_v40 = vld [vmem:[#allocation2 + $0x424] sm:$0xf]  ;;  %v2245_v44 = vor.u32 %v2936_v33, %v2242_v34  ;;  %v2923_v27 = vld [vmem:[#allocation2 + $0x1b4] sm:$0xf0] }
  0x58   :  { %1364 = vmatpush.bf16.msra.mxu0 %v2309_v54  ;;  %1378 = vmatpush.bf16.msra.mxu1 %v2437_v55  ;;  %v2498_v41 = vld [vmem:[#allocation2 + $0x430] sm:$0xf0]  ;;  %v3032_v42 = vld [vmem:[#allocation2 + $0x524] sm:$0xf]  ;;  %v2373_v48 = vor.u32 %v2968_v36, %v2370_v38  ;;  %v2312_v28 = vld [vmem:[#allocation2 + $0x2a8] sm:$0xf]  ;;  %v2185_v33 = vor.u32 %v2923_v27, %v2184_v25 }
  0x59   :  { %1392 = vmatpush.bf16.msra.mxu2 %v2565_v56  ;;  %v2626_v43 = vld [vmem:[#allocation2 + $0x530] sm:$0xf0]  ;;  %v2932_v45 = vld [vmem:[#allocation2 + $0x204] sm:$0xf]  ;;  %v2501_v49 = vor.u32 %v3000_v40, %v2498_v41  ;;  %v2088_v56 = vld [vmem:[#allocation2 + $0xe8] sm:$0xf] }
  0x5a   :  { %1406 = vmatpush.bf16.msra.mxu3 %v2693_v61  ;;  %v2226_v46 = vld [vmem:[#allocation2 + $0x210] sm:$0xf0]  ;;  %v2964_v47 = vld [vmem:[#allocation2 + $0x304] sm:$0xf]  ;;  %v2629_v53 = vor.u32 %v3032_v42, %v2626_v43  ;;  %v2931_v61 = vld [vmem:[#allocation2 + $0x1f4] sm:$0xf0] }
  0x5b   :  { %v2354_v50 = vld [vmem:[#allocation2 + $0x310] sm:$0xf0]  ;;  %v2996_v51 = vld [vmem:[#allocation2 + $0x404] sm:$0xf]  ;;  %v2229_v60 = vor.u32 %v2932_v45, %v2226_v46  ;;  %v2217_v7 = vor.u32 %v2931_v61, %v2216_v59  ;;  %v2955_v29 = vld [vmem:[#allocation2 + $0x2b4] sm:$0xf0] }
  0x5c   :  { %1365 = vmatpush.bf16.msra.mxu0 %v2293_v3  ;;  %1379 = vmatpush.bf16.msra.mxu1 %v2421_v4  ;;  %v2482_v52 = vld [vmem:[#allocation2 + $0x410] sm:$0xf0]  ;;  %v3028_v54 = vld [vmem:[#allocation2 + $0x504] sm:$0xf]  ;;  %v2357_v0 = vor.u32 %v2964_v47, %v2354_v50  ;;  %v2995_v3 = vld [vmem:[#allocation2 + $0x3f4] sm:$0xf0]  ;;  %v2313_v34 = vor.u32 %v2955_v29, %v2312_v28 }
  0x5d   :  { %1393 = vmatpush.bf16.msra.mxu2 %v2549_v5  ;;  %v2610_v55 = vld [vmem:[#allocation2 + $0x510] sm:$0xf0]  ;;  %v2485_v1 = vor.u32 %v2996_v51, %v2482_v52  ;;  %v2089_v5 = vor.u32 %v2899_v58, %v2088_v56  ;;  %v2473_v12 = vor.u32 %v2995_v3, %v2472_v2  ;;  %v2040_v36 = vld [vmem:[#allocation2 + $0x88] sm:$0xf]  ;;  %v2919_v41 = vld [vmem:[#allocation2 + $0x194] sm:$0xf0] }
  0x5e   :  { %1407 = vmatpush.bf16.msra.mxu3 %v2677_v10  ;;  %v2613_v4 = vor.u32 %v3028_v54, %v2610_v55  ;;  %v2895_v10 = vld [vmem:[#allocation2 + $0xd4] sm:$0xf0]  ;;  %v2168_v38 = vld [vmem:[#allocation2 + $0x188] sm:$0xf] }
  0x5f   :  { %v2296_v42 = vld [vmem:[#allocation2 + $0x288] sm:$0xf]  ;;  %v2951_v43 = vld [vmem:[#allocation2 + $0x294] sm:$0xf0]  ;;  %v2169_v47 = vor.u32 %v2919_v41, %v2168_v38  ;;  %v2897_v41 = vld [vmem:[#allocation2 + $0xec] sm:$0xf] }
  0x60   :  { %1366 = vmatpush.bf16.msra.mxu0 %v2277_v16  ;;  %1380 = vmatpush.bf16.msra.mxu1 %v2405_v17  ;;  %v2456_v16 = vld [vmem:[#allocation2 + $0x3c8] sm:$0xf]  ;;  %v2991_v17 = vld [vmem:[#allocation2 + $0x3d4] sm:$0xf0] }
  0x61   :  { %1394 = vmatpush.bf16.msra.mxu2 %v2533_v18  ;;  %v2073_v18 = vor.u32 %v2895_v10, %v2072_v9  ;;  %v2457_v26 = vor.u32 %v2991_v17, %v2456_v16  ;;  %v2983_v45 = vld [vmem:[#allocation2 + $0x394] sm:$0xf0]  ;;  %v2152_v51 = vld [vmem:[#allocation2 + $0x168] sm:$0xf] }
  0x62   :  { %1408 = vmatpush.bf16.msra.mxu3 %v2661_v24  ;;  %v2891_v24 = vld [vmem:[#allocation2 + $0xb4] sm:$0xf0]  ;;  %v2280_v54 = vld [vmem:[#allocation2 + $0x268] sm:$0xf] }
  0x63   :  { %v2883_v50 = vld [vmem:[#allocation2 + $0x74] sm:$0xf0]  ;;  %v2408_v56 = vld [vmem:[#allocation2 + $0x368] sm:$0xf] }
  0x64   :  { %1367 = vmatpush.bf16.msra.mxu0 %v2261_v30  ;;  %1381 = vmatpush.bf16.msra.mxu1 %v2389_v31  ;;  %v2440_v30 = vld [vmem:[#allocation2 + $0x3a8] sm:$0xf]  ;;  %v2987_v31 = vld [vmem:[#allocation2 + $0x3b4] sm:$0xf0] }
  0x65   :  { %1395 = vmatpush.bf16.msra.mxu2 %v2517_v32  ;;  %v2057_v32 = vor.u32 %v2891_v24, %v2056_v21  ;;  %v2441_v40 = vor.u32 %v2987_v31, %v2440_v30  ;;  %v2947_v55 = vld [vmem:[#allocation2 + $0x274] sm:$0xf0]  ;;  %v2008_v62 = vld [vmem:[#allocation2 + $0x48] sm:$0xf] }
  0x66   :  { %1409 = vmatpush.bf16.msra.mxu3 %v2645_v37  ;;  %v2887_v37 = vld [vmem:[#allocation2 + $0x94] sm:$0xf0]  ;;  %v2281_v61 = vor.u32 %v2947_v55, %v2280_v54  ;;  %v2264_v3 = vld [vmem:[#allocation2 + $0x248] sm:$0xf] }
  0x67   :  { %v2041_v46 = vor.u32 %v2887_v37, %v2040_v36  ;;  %v2979_v58 = vld [vmem:[#allocation2 + $0x374] sm:$0xf0]  ;;  %v1992_v11 = vld [vmem:[#allocation2 + $0x28] sm:$0xf] }
  0x68   :  { %1368 = vmatpush.bf16.msra.mxu0 %v2245_v44  ;;  %1382 = vmatpush.bf16.msra.mxu1 %v2373_v48  ;;  %v2424_v44 = vld [vmem:[#allocation2 + $0x388] sm:$0xf]  ;;  %v2297_v48 = vor.u32 %v2951_v43, %v2296_v42  ;;  %v2879_v63 = vld [vmem:[#allocation2 + $0x54] sm:$0xf0]  ;;  %v2090_v42 = vld [vmem:[#allocation2 + $0xf8] sm:$0xf0] }
  0x69   :  { %1396 = vmatpush.bf16.msra.mxu2 %v2501_v49  ;;  %v2024_v49 = vld [vmem:[#allocation2 + $0x68] sm:$0xf]  ;;  %v2425_v52 = vor.u32 %v2983_v45, %v2424_v44  ;;  %v2911_v2 = vld [vmem:[#allocation2 + $0x154] sm:$0xf0]  ;;  %v2929_v45 = vld [vmem:[#allocation2 + $0x1ec] sm:$0xf] }
  0x6a   :  { %1410 = vmatpush.bf16.msra.mxu3 %v2629_v53  ;;  %v2915_v53 = vld [vmem:[#allocation2 + $0x174] sm:$0xf0]  ;;  %v2025_v59 = vor.u32 %v2883_v50, %v2024_v49  ;;  %v2120_v13 = vld [vmem:[#allocation2 + $0x128] sm:$0xf]  ;;  %v2093_v50 = vor.u32 %v2897_v41, %v2090_v42 }
  0x6b   :  { %v2907_v15 = vld [vmem:[#allocation2 + $0x134] sm:$0xf0]  ;;  %v2248_v16 = vld [vmem:[#allocation2 + $0x228] sm:$0xf] }
  0x6c   :  { %1369 = vmatpush.bf16.msra.mxu0 %v2229_v60  ;;  %1383 = vmatpush.bf16.msra.mxu1 %v2357_v0  ;;  %v2153_v60 = vor.u32 %v2915_v53, %v2152_v51  ;;  %v2136_v0 = vld [vmem:[#allocation2 + $0x148] sm:$0xf]  ;;  %v2939_v17 = vld [vmem:[#allocation2 + $0x234] sm:$0xf0]  ;;  %v2121_v25 = vor.u32 %v2907_v15, %v2120_v13 }
  0x6d   :  { %1397 = vmatpush.bf16.msra.mxu2 %v2485_v1  ;;  %v2409_v1 = vor.u32 %v2979_v58, %v2408_v56  ;;  %v2137_v9 = vor.u32 %v2911_v2, %v2136_v0  ;;  %v1976_v21 = vld [vmem:[#allocation2 + $0x8] sm:$0xf]  ;;  %v2871_v24 = vld [vmem:[#allocation2 + $0x14] sm:$0xf0]  ;;  %v2893_v56 = vld [vmem:[#allocation2 + $0xcc] sm:$0xf] }
  0x6e   :  { %1411 = vmatpush.bf16.msra.mxu3 %v2613_v4  ;;  %v2943_v4 = vld [vmem:[#allocation2 + $0x254] sm:$0xf0]  ;;  %v2104_v27 = vld [vmem:[#allocation2 + $0x108] sm:$0xf]  ;;  %v1977_v38 = vor.u32 %v2871_v24, %v1976_v21  ;;  %v2074_v58 = vld [vmem:[#allocation2 + $0xd8] sm:$0xf0] }
  0x6f   :  { %1370 = vmatmul.bf16.vlgmr.msra.gmra.mxu0 %v3231_v22  ;;  %1384 = vmatmul.bf16.vlgmr.msra.gmra.mxu1 %v3233_v23  ;;  %v2265_v10 = vor.u32 %v2943_v4, %v2264_v3  ;;  %v2903_v28 = vld [vmem:[#allocation2 + $0x114] sm:$0xf0]  ;;  %v2232_v29 = vld [vmem:[#allocation2 + $0x208] sm:$0xf]  ;;  %v2170_v21 = vld [vmem:[#allocation2 + $0x198] sm:$0xf0] }
  0x70   :  { %1418 = vmatpush.bf16.msrb.mxu0 %v2089_v5  ;;  %1432 = vmatpush.bf16.msrb.mxu1 %v2217_v7  ;;  %v2392_v5 = vld [vmem:[#allocation2 + $0x348] sm:$0xf]  ;;  %v2975_v7 = vld [vmem:[#allocation2 + $0x354] sm:$0xf0]  ;;  %v2105_v43 = vor.u32 %v2903_v28, %v2104_v27 }
  0x71   :  { %1446 = vmatpush.bf16.msrb.mxu2 %v2345_v8  ;;  %1412 = vmatmul.bf16.vlgmr.msra.gmra.mxu3 %v3251_v39  ;;  %v2009_v8 = vor.u32 %v2879_v63, %v2008_v62  ;;  %v2393_v14 = vor.u32 %v2975_v7, %v2392_v5  ;;  %v2935_v31 = vld [vmem:[#allocation2 + $0x214] sm:$0xf0]  ;;  %v2728_v37 = vld [vmem:[#allocation2 + $0x5e8] sm:$0xf]  ;;  %v2077_v63 = vor.u32 %v2893_v56, %v2074_v58  ;;  %v2889_v5 = vld [vmem:[#allocation2 + $0xac] sm:$0xf] }
  0x72   :  { %1460 = vmatpush.bf16.msrb.mxu3 %v2473_v12  ;;  %1398 = vmatmul.bf16.vlgmr.msra.gmra.mxu2 %v3249_v35  ;;  %v2875_v12 = vld [vmem:[#allocation2 + $0x34] sm:$0xf0]  ;;  %v2233_v44 = vor.u32 %v2935_v31, %v2232_v29  ;;  %v2584_v51 = vld [vmem:[#allocation2 + $0x4c8] sm:$0xf]  ;;  %v2058_v7 = vld [vmem:[#allocation2 + $0xb8] sm:$0xf0] }
  0x73   :  { %v3027_v36 = vld [vmem:[#allocation2 + $0x4f4] sm:$0xf0]  ;;  %v2712_v53 = vld [vmem:[#allocation2 + $0x5c8] sm:$0xf] }
  0x74   :  { %1419 = vmatpush.bf16.msrb.mxu0 %v2073_v18  ;;  %1433 = vmatpush.bf16.msrb.mxu1 %v2201_v19  ;;  %v2376_v18 = vld [vmem:[#allocation2 + $0x328] sm:$0xf]  ;;  %v2971_v19 = vld [vmem:[#allocation2 + $0x334] sm:$0xf0] }
  0x75   :  { %1447 = vmatpush.bf16.msrb.mxu2 %v2329_v20  ;;  %v1993_v20 = vor.u32 %v2875_v12, %v1992_v11  ;;  %v2377_v30 = vor.u32 %v2971_v19, %v2376_v18  ;;  %v3055_v55 = vld [vmem:[#allocation2 + $0x5d4] sm:$0xf0]  ;;  %v2568_v0 = vld [vmem:[#allocation2 + $0x4a8] sm:$0xf]  ;;  %v2061_v12 = vor.u32 %v2889_v5, %v2058_v7  ;;  %v2885_v18 = vld [vmem:[#allocation2 + $0x8c] sm:$0xf] }
  0x76   :  { %1461 = vmatpush.bf16.msrb.mxu3 %v2457_v26  ;;  %v2249_v26 = vor.u32 %v2939_v17, %v2248_v16  ;;  %v2713_v62 = vor.u32 %v3055_v55, %v2712_v53  ;;  %v2696_v2 = vld [vmem:[#allocation2 + $0x5a8] sm:$0xf]  ;;  %v3051_v4 = vld [vmem:[#allocation2 + $0x5b4] sm:$0xf0]  ;;  %v2042_v19 = vld [vmem:[#allocation2 + $0x98] sm:$0xf0] }
  0x77   :  { %v2697_v11 = vor.u32 %v3051_v4, %v2696_v2  ;;  %v2552_v13 = vld [vmem:[#allocation2 + $0x488] sm:$0xf]  ;;  %v3047_v17 = vld [vmem:[#allocation2 + $0x594] sm:$0xf0]  ;;  %v2869_v7 = vld [vmem:[#allocation2 + $0xc] sm:$0xf] }
  0x78   :  { %1420 = vmatpush.bf16.msrb.mxu0 %v2057_v32  ;;  %1434 = vmatpush.bf16.msrb.mxu1 %v2185_v33  ;;  %v2360_v32 = vld [vmem:[#allocation2 + $0x308] sm:$0xf]  ;;  %v2967_v33 = vld [vmem:[#allocation2 + $0x314] sm:$0xf0] }
  0x79   :  { %1448 = vmatpush.bf16.msrb.mxu2 %v2313_v34  ;;  %v2600_v34 = vld [vmem:[#allocation2 + $0x4e8] sm:$0xf]  ;;  %v3011_v28 = vld [vmem:[#allocation2 + $0x474] sm:$0xf0] }
  0x7a   :  { %1462 = vmatpush.bf16.msrb.mxu3 %v2441_v40  ;;  %v3059_v40 = vld [vmem:[#allocation2 + $0x5f4] sm:$0xf0]  ;;  %v2680_v15 = vld [vmem:[#allocation2 + $0x588] sm:$0xf] }
  0x7b   :  { %v2729_v49 = vor.u32 %v3059_v40, %v2728_v37  ;;  %v2536_v27 = vld [vmem:[#allocation2 + $0x468] sm:$0xf]  ;;  %v3043_v31 = vld [vmem:[#allocation2 + $0x574] sm:$0xf0] }
  0x7c   :  { %1421 = vmatpush.bf16.msrb.mxu0 %v2041_v46  ;;  %1435 = vmatpush.bf16.msrb.mxu1 %v2169_v47  ;;  %v2218_v46 = vld [vmem:[#allocation2 + $0x1f8] sm:$0xf0]  ;;  %v2361_v47 = vor.u32 %v2967_v33, %v2360_v32  ;;  %v2664_v29 = vld [vmem:[#allocation2 + $0x568] sm:$0xf]  ;;  %v2881_v32 = vld [vmem:[#allocation2 + $0x6c] sm:$0xf]  ;;  %v2537_v37 = vor.u32 %v3011_v28, %v2536_v27 }
  0x7d   :  { %1449 = vmatpush.bf16.msrb.mxu2 %v2297_v48  ;;  %v2601_v48 = vor.u32 %v3027_v36, %v2600_v34  ;;  %v2221_v54 = vor.u32 %v2929_v45, %v2218_v46  ;;  %v2026_v33 = vld [vmem:[#allocation2 + $0x78] sm:$0xf0]  ;;  %v2913_v34 = vld [vmem:[#allocation2 + $0x16c] sm:$0xf]  ;;  %v2520_v41 = vld [vmem:[#allocation2 + $0x448] sm:$0xf] }
  0x7e   :  { %1463 = vmatpush.bf16.msrb.mxu3 %v2425_v52  ;;  %v3023_v52 = vld [vmem:[#allocation2 + $0x4d4] sm:$0xf0]  ;;  %v2154_v36 = vld [vmem:[#allocation2 + $0x178] sm:$0xf0]  ;;  %v2029_v40 = vor.u32 %v2881_v32, %v2026_v33  ;;  %v2877_v46 = vld [vmem:[#allocation2 + $0x4c] sm:$0xf] }
  0x7f   :  { %v3007_v42 = vld [vmem:[#allocation2 + $0x454] sm:$0xf0]  ;;  %v2504_v53 = vld [vmem:[#allocation2 + $0x428] sm:$0xf]  ;;  %v2458_v33 = vld [vmem:[#allocation2 + $0x3d8] sm:$0xf0] }
  0x80   :  { %1422 = vmatpush.bf16.msrb.mxu0 %v2025_v59  ;;  %1436 = vmatpush.bf16.msrb.mxu1 %v2153_v60  ;;  %v2925_v59 = vld [vmem:[#allocation2 + $0x1cc] sm:$0xf]  ;;  %v2202_v60 = vld [vmem:[#allocation2 + $0x1d8] sm:$0xf0]  ;;  %v3039_v45 = vld [vmem:[#allocation2 + $0x554] sm:$0xf0] }
  0x81   :  { %1450 = vmatpush.bf16.msrb.mxu2 %v2281_v61  ;;  %v2585_v61 = vor.u32 %v3023_v52, %v2584_v51  ;;  %v2205_v3 = vor.u32 %v2925_v59, %v2202_v60  ;;  %v2632_v55 = vld [vmem:[#allocation2 + $0x528] sm:$0xf]  ;;  %v3035_v58 = vld [vmem:[#allocation2 + $0x534] sm:$0xf0]  ;;  %v2873_v59 = vld [vmem:[#allocation2 + $0x2c] sm:$0xf] }
  0x82   :  { %1464 = vmatpush.bf16.msrb.mxu3 %v2409_v1  ;;  %v3019_v1 = vld [vmem:[#allocation2 + $0x4b4] sm:$0xf0]  ;;  %v1994_v60 = vld [vmem:[#allocation2 + $0x38] sm:$0xf0]  ;;  %v2633_v2 = vor.u32 %v3035_v58, %v2632_v55  ;;  %v2616_v4 = vld [vmem:[#allocation2 + $0x508] sm:$0xf] }
  0x83   :  { %v3031_v5 = vld [vmem:[#allocation2 + $0x514] sm:$0xf0]  ;;  %v2949_v55 = vld [vmem:[#allocation2 + $0x28c] sm:$0xf] }
  0x84   :  { %1423 = vmatpush.bf16.msrb.mxu0 %v2009_v8  ;;  %1437 = vmatpush.bf16.msrb.mxu1 %v2137_v9  ;;  %v2921_v8 = vld [vmem:[#allocation2 + $0x1ac] sm:$0xf]  ;;  %v2186_v9 = vld [vmem:[#allocation2 + $0x1b8] sm:$0xf0] }
  0x85   :  { %1451 = vmatpush.bf16.msrb.mxu2 %v2265_v10  ;;  %v2569_v10 = vor.u32 %v3019_v1, %v2568_v0  ;;  %v2189_v16 = vor.u32 %v2921_v8, %v2186_v9  ;;  %v2488_v0 = vld [vmem:[#allocation2 + $0x408] sm:$0xf]  ;;  %v2999_v1 = vld [vmem:[#allocation2 + $0x414] sm:$0xf0]  ;;  %v1978_v9 = vld [vmem:[#allocation2 + $0x18] sm:$0xf0] }
  0x86   :  { %1465 = vmatpush.bf16.msrb.mxu3 %v2393_v14  ;;  %v3015_v14 = vld [vmem:[#allocation2 + $0x494] sm:$0xf0]  ;;  %v2981_v58 = vld [vmem:[#allocation2 + $0x38c] sm:$0xf] }
  0x87   :  { %v2553_v24 = vor.u32 %v3015_v14, %v2552_v13  ;;  %v2346_v13 = vld [vmem:[#allocation2 + $0x2f8] sm:$0xf0]  ;;  %v2993_v14 = vld [vmem:[#allocation2 + $0x3ec] sm:$0xf] }
  0x88   :  { %1424 = vmatpush.bf16.msrb.mxu0 %v1993_v20  ;;  %1438 = vmatpush.bf16.msrb.mxu1 %v2121_v25  ;;  %v2917_v20 = vld [vmem:[#allocation2 + $0x18c] sm:$0xf]  ;;  %v2681_v25 = vor.u32 %v3047_v17, %v2680_v15  ;;  %v2489_v15 = vor.u32 %v2999_v1, %v2488_v0 }
  0x89   :  { %1452 = vmatpush.bf16.msrb.mxu2 %v2249_v26  ;;  %v2045_v26 = vor.u32 %v2885_v18, %v2042_v19  ;;  %v3025_v17 = vld [vmem:[#allocation2 + $0x4ec] sm:$0xf]  ;;  %v2602_v18 = vld [vmem:[#allocation2 + $0x4f8] sm:$0xf0]  ;;  %v2617_v19 = vor.u32 %v3031_v5, %v2616_v4 }
  0x8a   :  { %1466 = vmatpush.bf16.msrb.mxu3 %v2377_v30  ;;  %v2173_v30 = vor.u32 %v2917_v20, %v2170_v21  ;;  %v1981_v20 = vor.u32 %v2869_v7, %v1978_v9  ;;  %v3057_v21 = vld [vmem:[#allocation2 + $0x5ec] sm:$0xf]  ;;  %v2605_v28 = vor.u32 %v3025_v17, %v2602_v18  ;;  %v2410_v7 = vld [vmem:[#allocation2 + $0x378] sm:$0xf0] }
  0x8b   :  { %v2977_v4 = vld [vmem:[#allocation2 + $0x36c] sm:$0xf]  ;;  %v2538_v9 = vld [vmem:[#allocation2 + $0x478] sm:$0xf0] }
  0x8c   :  { %1425 = vmatpush.bf16.msrb.mxu0 %v1977_v38  ;;  %1439 = vmatpush.bf16.msrb.mxu1 %v2105_v43  ;;  %v2665_v38 = vor.u32 %v3043_v31, %v2664_v29  ;;  %v2648_v43 = vld [vmem:[#allocation2 + $0x548] sm:$0xf]  ;;  %v2957_v29 = vld [vmem:[#allocation2 + $0x2cc] sm:$0xf] }
  0x8d   :  { %1453 = vmatpush.bf16.msrb.mxu2 %v2233_v44  ;;  %v2157_v44 = vor.u32 %v2913_v34, %v2154_v36  ;;  %v2649_v51 = vor.u32 %v3039_v45, %v2648_v43  ;;  %v2989_v31 = vld [vmem:[#allocation2 + $0x3cc] sm:$0xf]  ;;  %v2586_v36 = vld [vmem:[#allocation2 + $0x4d8] sm:$0xf0] }
  0x8e   :  { %1467 = vmatpush.bf16.msrb.mxu3 %v2361_v47  ;;  %v2010_v47 = vld [vmem:[#allocation2 + $0x58] sm:$0xf0]  ;;  %v3021_v34 = vld [vmem:[#allocation2 + $0x4cc] sm:$0xf] }
  0x8f   :  { %1426 = vmatmul.bf16.vlgmr.msrb.gmra.mxu0 %v3207_v57  ;;  %1440 = vmatmul.bf16.vlgmr.msrb.gmra.mxu1 %v3216_v6  ;;  %v2013_v52 = vor.u32 %v2877_v46, %v2010_v47  ;;  %v2953_v43 = vld [vmem:[#allocation2 + $0x2ac] sm:$0xf]  ;;  %v2442_v47 = vld [vmem:[#allocation2 + $0x3b8] sm:$0xf0] }
  0x90   :  { %1474 = vmatpush.bf16.msra.mxu0 %v2601_v48  ;;  %1488 = vmatpush.bf16.msra.mxu1 %v2729_v49  ;;  %v2909_v48 = vld [vmem:[#allocation2 + $0x14c] sm:$0xf]  ;;  %v2138_v49 = vld [vmem:[#allocation2 + $0x158] sm:$0xf0] }
  0x91   :  { %1502 = vmatpush.bf16.msra.mxu2 %v2093_v50  ;;  %1468 = vmatmul.bf16.vlgmr.msrb.gmra.mxu3 %v3233_v23  ;;  %v2521_v50 = vor.u32 %v3007_v42, %v2520_v41  ;;  %v2141_v56 = vor.u32 %v2909_v48, %v2138_v49  ;;  %v2461_v41 = vor.u32 %v2989_v31, %v2458_v33  ;;  %v2985_v45 = vld [vmem:[#allocation2 + $0x3ac] sm:$0xf]  ;;  %v2570_v49 = vld [vmem:[#allocation2 + $0x4b8] sm:$0xf0] }
  0x92   :  { %1516 = vmatpush.bf16.msra.mxu3 %v2221_v54  ;;  %1454 = vmatmul.bf16.vlgmr.msrb.gmra.mxu2 %v3231_v22  ;;  %v3003_v54 = vld [vmem:[#allocation2 + $0x434] sm:$0xf0]  ;;  %v2589_v42 = vor.u32 %v3021_v34, %v2586_v36  ;;  %v3017_v48 = vld [vmem:[#allocation2 + $0x4ac] sm:$0xf]  ;;  %v2250_v31 = vld [vmem:[#allocation2 + $0x238] sm:$0xf0] }
  0x93   :  { %v2973_v17 = vld [vmem:[#allocation2 + $0x34c] sm:$0xf]  ;;  %v2378_v34 = vld [vmem:[#allocation2 + $0x338] sm:$0xf0] }
  0x94   :  { %1475 = vmatpush.bf16.msra.mxu0 %v2585_v61  ;;  %1489 = vmatpush.bf16.msra.mxu1 %v2713_v62  ;;  %v2905_v61 = vld [vmem:[#allocation2 + $0x12c] sm:$0xf]  ;;  %v2122_v62 = vld [vmem:[#allocation2 + $0x138] sm:$0xf0] }
  0x95   :  { %1503 = vmatpush.bf16.msra.mxu2 %v2077_v63  ;;  %v2505_v63 = vor.u32 %v3003_v54, %v2504_v53  ;;  %v2125_v8 = vor.u32 %v2905_v61, %v2122_v62  ;;  %v2445_v53 = vor.u32 %v2985_v45, %v2442_v47  ;;  %v2573_v54 = vor.u32 %v3017_v48, %v2570_v49  ;;  %v3013_v61 = vld [vmem:[#allocation2 + $0x48c] sm:$0xf]  ;;  %v2554_v62 = vld [vmem:[#allocation2 + $0x498] sm:$0xf0] }
  0x96   :  { %1517 = vmatpush.bf16.msra.mxu3 %v2205_v3  ;;  %v1997_v3 = vor.u32 %v2873_v59, %v1994_v60  ;;  %v2426_v60 = vld [vmem:[#allocation2 + $0x398] sm:$0xf0]  ;;  %v3001_v36 = vld [vmem:[#allocation2 + $0x42c] sm:$0xf] }
  0x97   :  { %v2429_v1 = vor.u32 %v2981_v58, %v2426_v60  ;;  %v2933_v45 = vld [vmem:[#allocation2 + $0x20c] sm:$0xf]  ;;  %v2362_v49 = vld [vmem:[#allocation2 + $0x318] sm:$0xf0] }
  0x98   :  { %1476 = vmatpush.bf16.msra.mxu0 %v2569_v10  ;;  %1490 = vmatpush.bf16.msra.mxu1 %v2697_v11  ;;  %v2901_v10 = vld [vmem:[#allocation2 + $0x10c] sm:$0xf]  ;;  %v2106_v11 = vld [vmem:[#allocation2 + $0x118] sm:$0xf0] }
  0x99   :  { %1504 = vmatpush.bf16.msra.mxu2 %v2061_v12  ;;  %v2961_v12 = vld [vmem:[#allocation2 + $0x2ec] sm:$0xf]  ;;  %v3067_v60 = vld [vmem:[#allocation4 + $0x38] sm:$0xff] }
  0x9a   :  { %1518 = vmatpush.bf16.msra.mxu3 %v2189_v16  ;;  %v2474_v16 = vld [vmem:[#allocation2 + $0x3f8] sm:$0xf0]  ;;  %v2965_v47 = vld [vmem:[#allocation2 + $0x30c] sm:$0xf] }
  0x9b   :  { %v2477_v27 = vor.u32 %v2993_v14, %v2474_v16  ;;  %v2266_v16 = vld [vmem:[#allocation2 + $0x258] sm:$0xf0] }
  0x9c   :  { %1477 = vmatpush.bf16.msra.mxu0 %v2553_v24  ;;  %1491 = vmatpush.bf16.msra.mxu1 %v2681_v25  ;;  %v2730_v24 = vld [vmem:[#allocation2 + $0x5f8] sm:$0xf0]  ;;  %v2109_v25 = vor.u32 %v2901_v10, %v2106_v11  ;;  %v3041_v10 = vld [vmem:[#allocation2 + $0x56c] sm:$0xf] }
  0x9d   :  { %1505 = vmatpush.bf16.msra.mxu2 %v2045_v26  ;;  %v2349_v26 = vor.u32 %v2961_v12, %v2346_v13  ;;  %v2733_v32 = vor.u32 %v3057_v21, %v2730_v24  ;;  %v2666_v11 = vld [vmem:[#allocation2 + $0x578] sm:$0xf0]  ;;  %v2413_v13 = vor.u32 %v2977_v4, %v2410_v7  ;;  %v3037_v24 = vld [vmem:[#allocation2 + $0x54c] sm:$0xf]  ;;  %v3074_v4 = vld [vmem:[#allocation4 + $0x70] sm:$0xff] }
  0x9e   :  { %1519 = vmatpush.bf16.msra.mxu3 %v2173_v30  ;;  %v2330_v30 = vld [vmem:[#allocation2 + $0x2d8] sm:$0xf0]  ;;  %v2669_v18 = vor.u32 %v3041_v10, %v2666_v11  ;;  %v3073_v10 = vld [vmem:[#allocation4 + $0x68] sm:$0xff] }
  0x9f   :  { %v2522_v21 = vld [vmem:[#allocation2 + $0x458] sm:$0xf0] }
  0xa0   :  { %1478 = vmatpush.bf16.msra.mxu0 %v2537_v37  ;;  %1492 = vmatpush.bf16.msra.mxu1 %v2665_v38  ;;  %v3053_v37 = vld [vmem:[#allocation2 + $0x5cc] sm:$0xf]  ;;  %v2714_v38 = vld [vmem:[#allocation2 + $0x5d8] sm:$0xf0] }
  0xa1   :  { %1506 = vmatpush.bf16.msra.mxu2 %v2029_v40  ;;  %v2333_v40 = vor.u32 %v2957_v29, %v2330_v30  ;;  %v2717_v46 = vor.u32 %v3053_v37, %v2714_v38  ;;  %v2937_v30 = vld [vmem:[#allocation2 + $0x22c] sm:$0xf]  ;;  %v2506_v37 = vld [vmem:[#allocation2 + $0x438] sm:$0xf0] }
  0xa2   :  { %1520 = vmatpush.bf16.msra.mxu3 %v2157_v44  ;;  %v2314_v44 = vld [vmem:[#allocation2 + $0x2b8] sm:$0xf0] }
  0xa4   :  { %1479 = vmatpush.bf16.msra.mxu0 %v2521_v50  ;;  %1493 = vmatpush.bf16.msra.mxu1 %v2649_v51  ;;  %v3049_v50 = vld [vmem:[#allocation2 + $0x5ac] sm:$0xf]  ;;  %v2698_v51 = vld [vmem:[#allocation2 + $0x5b8] sm:$0xf0] }
  0xa5   :  { %1507 = vmatpush.bf16.msra.mxu2 %v2013_v52  ;;  %v2317_v52 = vor.u32 %v2953_v43, %v2314_v44  ;;  %v2701_v59 = vor.u32 %v3049_v50, %v2698_v51  ;;  %v2509_v44 = vor.u32 %v3001_v36, %v2506_v37  ;;  %v2997_v50 = vld [vmem:[#allocation2 + $0x40c] sm:$0xf]  ;;  %v2490_v51 = vld [vmem:[#allocation2 + $0x418] sm:$0xf0]  ;;  %v3068_v36 = vld [vmem:[#allocation4 + $0x40] sm:$0xff] }
  0xa6   :  { %1521 = vmatpush.bf16.msra.mxu3 %v2141_v56  ;;  %v2298_v56 = vld [vmem:[#allocation2 + $0x298] sm:$0xf0]  ;;  %v2493_v58 = vor.u32 %v2997_v50, %v2490_v51 }
  0xa7   :  { %v2301_v0 = vor.u32 %v2949_v55, %v2298_v56  ;;  %v2365_v56 = vor.u32 %v2965_v47, %v2362_v49 }
  0xa8   :  { %1480 = vmatpush.bf16.msra.mxu0 %v2505_v63  ;;  %1494 = vmatpush.bf16.msra.mxu1 %v2633_v2  ;;  %v3045_v63 = vld [vmem:[#allocation2 + $0x58c] sm:$0xf] }
  0xa9   :  { %1508 = vmatpush.bf16.msra.mxu2 %v1997_v3  ;;  %v2945_v2 = vld [vmem:[#allocation2 + $0x26c] sm:$0xf]  ;;  %v2282_v3 = vld [vmem:[#allocation2 + $0x278] sm:$0xf0] }
  0xaa   :  { %1522 = vmatpush.bf16.msra.mxu3 %v2125_v8  ;;  %v3009_v8 = vld [vmem:[#allocation2 + $0x46c] sm:$0xf]  ;;  %v2285_v12 = vor.u32 %v2945_v2, %v2282_v3 }
  0xab   :  { %v2541_v14 = vor.u32 %v3009_v8, %v2538_v9 }
  0xac   :  { %1481 = vmatpush.bf16.msra.mxu0 %v2489_v15  ;;  %1495 = vmatpush.bf16.msra.mxu1 %v2617_v19  ;;  %v2941_v15 = vld [vmem:[#allocation2 + $0x24c] sm:$0xf]  ;;  %v2394_v19 = vld [vmem:[#allocation2 + $0x358] sm:$0xf0]  ;;  %v1273_v38 = vpop.f32.mrf.mxu1 }
  0xad   :  { %1509 = vmatpush.bf16.msra.mxu2 %v1981_v20  ;;  %v3005_v20 = vld [vmem:[#allocation2 + $0x44c] sm:$0xf] }
  0xae   :  { %1523 = vmatpush.bf16.msra.mxu3 %v2109_v25  ;;  %v2650_v25 = vld [vmem:[#allocation2 + $0x558] sm:$0xf0] }
  0xaf   :  { %1482 = vmatmul.bf16.vlgmr.msra.gmra.mxu0 %v3249_v35  ;;  %1496 = vmatmul.bf16.vlgmr.msra.gmra.mxu1 %v3251_v39  ;;  %v2653_v33 = vor.u32 %v3037_v24, %v2650_v25  ;;  %v3070_v24 = vld [vmem:[#allocation4 + $0x50] sm:$0xff] }
  0xb0   :  { %1530 = vmatpush.bf16.msrb.mxu0 %v2349_v26  ;;  %1544 = vmatpush.bf16.msrb.mxu1 %v2477_v27  ;;  %v2269_v26 = vor.u32 %v2941_v15, %v2266_v16  ;;  %v2397_v27 = vor.u32 %v2973_v17, %v2394_v19  ;;  %v1259_v29 = vpop.f32.mrf.mxu0  ;;  %v3072_v15 = vld [vmem:[#allocation4 + $0x60] sm:$0xff]  ;;  %v3062_v19 = vld [vmem:[#allocation4 + $0x10] sm:$0xff] }
  0xb1   :  { %1558 = vmatpush.bf16.msrb.mxu2 %v2605_v28  ;;  %1524 = vmatmul.bf16.vlgmr.msra.gmra.mxu3 %v3216_v6  ;;  %v2557_v6 = vor.u32 %v3013_v61, %v2554_v62  ;;  %v2525_v28 = vor.u32 %v3005_v20, %v2522_v21 }
  0xb2   :  { %1572 = vmatpush.bf16.msrb.mxu3 %v2733_v32  ;;  %1510 = vmatmul.bf16.vlgmr.msra.gmra.mxu2 %v3207_v57  ;;  %v2682_v57 = vld [vmem:[#allocation2 + $0x598] sm:$0xf0]  ;;  %v2969_v32 = vld [vmem:[#allocation2 + $0x32c] sm:$0xf] }
  0xb3   :  { %v2685_v5 = vor.u32 %v3045_v63, %v2682_v57  ;;  %v2381_v43 = vor.u32 %v2969_v32, %v2378_v34 }
  0xb4   :  { %1531 = vmatpush.bf16.msrb.mxu0 %v2333_v40  ;;  %1545 = vmatpush.bf16.msrb.mxu1 %v2461_v41  ;;  %v3033_v40 = vld [vmem:[#allocation2 + $0x52c] sm:$0xf]  ;;  %v2634_v41 = vld [vmem:[#allocation2 + $0x538] sm:$0xf0]  ;;  %v1275_v57 = vpop.f32.mrf.mxu1 }
  0xb5   :  { %1559 = vmatpush.bf16.msrb.mxu2 %v2589_v42  ;;  %v2253_v42 = vor.u32 %v2937_v30, %v2250_v31  ;;  %v2637_v48 = vor.u32 %v3033_v40, %v2634_v41  ;;  %v3060_v30 = vld [vmem:[#allocation4] sm:$0xff] }
  0xb6   :  { %1573 = vmatpush.bf16.msrb.mxu3 %v2717_v46  ;;  %v2234_v46 = vld [vmem:[#allocation2 + $0x218] sm:$0xf0] }
  0xb7   :  { %v2237_v55 = vor.u32 %v2933_v45, %v2234_v46  ;;  %v3083_v46 = vld [vmem:[#allocation4 + $0xb8] sm:$0xff] }
  0xb8   :  { %1532 = vmatpush.bf16.msrb.mxu0 %v2317_v52  ;;  %1546 = vmatpush.bf16.msrb.mxu1 %v2445_v53  ;;  %v3029_v52 = vld [vmem:[#allocation2 + $0x50c] sm:$0xf]  ;;  %v2618_v53 = vld [vmem:[#allocation2 + $0x518] sm:$0xf0]  ;;  %v1261_v63 = vpop.f32.mrf.mxu0 }
  0xb9   :  { %1560 = vmatpush.bf16.msrb.mxu2 %v2573_v54  ;;  %v3272_v54 = vld [vmem:[%s3293_s2] sm:$0xf] }
  0xba   :  { %1574 = vmatpush.bf16.msrb.mxu3 %v2701_v59  ;;  %v2621_v59 = vor.u32 %v3029_v52, %v2618_v53  ;;  %v252_v62 = vperm.slane %v3272_v54, 0 }
  0xbc   :  { %1533 = vmatpush.bf16.msrb.mxu0 %v2301_v0  ;;  %1547 = vmatpush.bf16.msrb.mxu1 %v2429_v1  ;;  %v3075_v0 = vld [vmem:[#allocation4 + $0x78] sm:$0xff]  ;;  %v3066_v1 = vld [vmem:[#allocation4 + $0x30] sm:$0xff]  ;;  %v1260_v2 = vadd.f32 %v1259_v29, %v252_v62  ;;  %v1262_v3 = vadd.f32 %v1261_v63, %v252_v62  ;;  %v3069_v29 = vld [vmem:[#allocation4 + $0x48] sm:$0xff] }
  0xbd   :  { %1561 = vmatpush.bf16.msrb.mxu2 %v2557_v6  ;;  %v1287_v61 = vpop.f32.mrf.mxu2  ;;  %v1301_v6 = vpop.f32.mrf.mxu3 }
  0xbe   :  { %1575 = vmatpush.bf16.msrb.mxu3 %v2685_v5  ;;  %v3065_v5 = vld [vmem:[#allocation4 + $0x28] sm:$0xff]  ;;  %v1274_v7 = vadd.f32 %v1273_v38, %v1260_v2  ;;  %v1276_v8 = vadd.f32 %v1275_v57, %v1262_v3  ;;  %v253_v38 = vperm.slane %v3272_v54, 1 }
  0xc0   :  { %1534 = vmatpush.bf16.msrb.mxu0 %v2285_v12  ;;  %1548 = vmatpush.bf16.msrb.mxu1 %v2413_v13  ;;  %v3064_v12 = vld [vmem:[#allocation4 + $0x20] sm:$0xff]  ;;  %v1288_v13 = vadd.f32 %v1287_v61, %v1274_v7  ;;  %v3078_v7 = vld [vmem:[#allocation4 + $0x90] sm:$0xff] }
  0xc1   :  { %1562 = vmatpush.bf16.msrb.mxu2 %v2541_v14 }
  0xc2   :  { %1576 = vmatpush.bf16.msrb.mxu3 %v2669_v18  ;;  %v1302_v16 = vadd.f32 %v1301_v6, %v1288_v13  ;;  %v3071_v18 = vld [vmem:[#allocation4 + $0x58] sm:$0xff] }
  0xc4   :  { %1535 = vmatpush.bf16.msrb.mxu0 %v2269_v26  ;;  %1549 = vmatpush.bf16.msrb.mxu1 %v2397_v27  ;;  %v3061_v26 = vld [vmem:[#allocation4 + $0x8] sm:$0xff] }
  0xc5   :  { %1563 = vmatpush.bf16.msrb.mxu2 %v2525_v28  ;;  %v1289_v9 = vpop.f32.mrf.mxu2 }
  0xc6   :  { %1577 = vmatpush.bf16.msrb.mxu3 %v2653_v33  ;;  %v1290_v14 = vadd.f32 %v1289_v9, %v1276_v8  ;;  %v3077_v8 = vld [vmem:[#allocation4 + $0x88] sm:$0xff] }
  0xc8   :  { %1536 = vmatpush.bf16.msrb.mxu0 %v2253_v42  ;;  %1550 = vmatpush.bf16.msrb.mxu1 %v2381_v43 }
  0xc9   :  { %1564 = vmatpush.bf16.msrb.mxu2 %v2509_v44 }
  0xca   :  { %1578 = vmatpush.bf16.msrb.mxu3 %v2637_v48  ;;  %v3082_v48 = vld [vmem:[#allocation4 + $0xb0] sm:$0xff] }
  0xcc   :  { %1537 = vmatpush.bf16.msrb.mxu0 %v2237_v55  ;;  %1551 = vmatpush.bf16.msrb.mxu1 %v2365_v56  ;;  %v1315_v11 = vpop.f32.mrf.mxu0  ;;  %v3081_v56 = vld [vmem:[#allocation4 + $0xa8] sm:$0xff] }
  0xcd   :  { %1565 = vmatpush.bf16.msrb.mxu2 %v2493_v58  ;;  %v1316_v20 = vadd.f32 %v1315_v11, %v1302_v16  ;;  %v3076_v11 = vld [vmem:[#allocation4 + $0x80] sm:$0xff] }
  0xce   :  { %1579 = vmatpush.bf16.msrb.mxu3 %v2621_v59 }
  0xcf   :  { %1538 = vmatmul.bf16.vlgmr.msrb.gmra.mxu0 %v3231_v22  ;;  %1552 = vmatmul.bf16.vlgmr.msrb.gmra.mxu1 %v3233_v23  ;;  %v1329_v22 = vpop.f32.mrf.mxu1  ;;  %v1303_v23 = vpop.f32.mrf.mxu3 }
  0xd0   :  { %1858 = vmatpush.bf16.msra.mxu0 %v3067_v60  ;;  %1872 = vmatpush.bf16.msra.mxu1 %v3075_v0  ;;  %v1330_v27 = vadd.f32 %v1329_v22, %v1316_v20  ;;  %v3080_v60 = vld [vmem:[#allocation4 + $0xa0] sm:$0xff]  ;;  %v3091_v22 = vld [vmem:[#allocation4 + $0xf8] sm:$0xff]  ;;  %v3089_v20 = vld [vmem:[#allocation4 + $0xe8] sm:$0xff] }
  0xd1   :  { %1566 = vmatmul.bf16.vlgmr.msrb.gmra.mxu2 %v3249_v35  ;;  %1580 = vmatmul.bf16.vlgmr.msrb.gmra.mxu3 %v3251_v39  ;;  %v3063_v35 = vld [vmem:[#allocation4 + $0x18] sm:$0xff]  ;;  %v1304_v39 = vadd.f32 %v1303_v23, %v1290_v14 }
  0xd2   :  { %v1586_v32 = vmax.f32 %v1330_v27, 0.0  ;;  %1886 = vmatpush.bf16.msra.mxu2 %v3083_v46  ;;  %1900 = vmatpush.bf16.msra.mxu3 %v3091_v22 }
  0xd4   :  { %1859 = vmatpush.bf16.msra.mxu0 %v3066_v1  ;;  %1873 = vmatpush.bf16.msra.mxu1 %v3074_v4  ;;  %v1317_v17 = vpop.f32.mrf.mxu0 }
  0xd5   :  { %v1318_v21 = vadd.f32 %v1317_v17, %v1304_v39  ;;  %v1343_v31 = vpop.f32.mrf.mxu2 }
  0xd6   :  { %v1344_v40 = vadd.f32 %v1343_v31, %v253_v38  ;;  %1887 = vmatpush.bf16.msra.mxu2 %v3082_v48  ;;  %v255_v48 = vperm.slane %v3272_v54, 3 }
  0xd7   :  { %v1331_v25 = vpop.f32.mrf.mxu1  ;;  %v1357_v34 = vpop.f32.mrf.mxu3 }
  0xd8   :  { %1860 = vmatpush.bf16.msra.mxu0 %v3065_v5  ;;  %1874 = vmatpush.bf16.msra.mxu1 %v3073_v10  ;;  %v1332_v28 = vadd.f32 %v1331_v25, %v1318_v21  ;;  %v1358_v43 = vadd.f32 %v1357_v34, %v1344_v40  ;;  %v3079_v5 = vld [vmem:[#allocation4 + $0x98] sm:$0xff] }
  0xda   :  { %v1590_v33 = vmax.f32 %v1332_v28, 0.0  ;;  %1888 = vmatpush.bf16.msra.mxu2 %v3081_v56 }
  0xdc   :  { %1861 = vmatpush.bf16.msra.mxu0 %v3064_v12  ;;  %1875 = vmatpush.bf16.msra.mxu1 %v3072_v15  ;;  %v1594_v37 = vpack.c.bf16 %v1590_v33, %v1586_v32  ;;  %v254_v12 = vperm.slane %v3272_v54, 2  ;;  %v3090_v15 = vld [vmem:[#allocation4 + $0xf0] sm:$0xff]  ;;  %v3087_v32 = vld [vmem:[#allocation4 + $0xd8] sm:$0xff] }
  0xdd   :  { %v1345_v41 = vpop.f32.mrf.mxu2  ;;  %1901 = vmatpush.bf16.msra.mxu3 %v3090_v15 }
  0xde   :  { %v1346_v47 = vadd.f32 %v1345_v41, %v253_v38  ;;  %1889 = vmatpush.bf16.msra.mxu2 %v3080_v60  ;;  %v3086_v38 = vld [vmem:[#allocation4 + $0xd0] sm:$0xff] }
  0xdf   :  { %v1359_v42 = vpop.f32.mrf.mxu3 }
  0xe0   :  { %1862 = vmatpush.bf16.msra.mxu0 %v3063_v35  ;;  %1876 = vmatpush.bf16.msra.mxu1 %v3071_v18  ;;  %v1360_v50 = vadd.f32 %v1359_v42, %v1346_v47 }
  0xe1   :  { %1902 = vmatpush.bf16.msra.mxu3 %v3089_v20 }
  0xe2   :  { %1890 = vmatpush.bf16.msra.mxu2 %v3079_v5 }
  0xe4   :  { %1863 = vmatpush.bf16.msra.mxu0 %v3062_v19  ;;  %1877 = vmatpush.bf16.msra.mxu1 %v3070_v24 }
  0xe6   :  { %1891 = vmatpush.bf16.msra.mxu2 %v3078_v7 }
  0xe8   :  { %1864 = vmatpush.bf16.msra.mxu0 %v3061_v26  ;;  %1878 = vmatpush.bf16.msra.mxu1 %v3069_v29  ;;  %v3088_v26 = vld [vmem:[#allocation4 + $0xe0] sm:$0xff] }
  0xe9   :  { %1903 = vmatpush.bf16.msra.mxu3 %v3088_v26 }
  0xea   :  { %1892 = vmatpush.bf16.msra.mxu2 %v3077_v8 }
  0xec   :  { %1865 = vmatpush.bf16.msra.mxu0 %v3060_v30  ;;  %1879 = vmatpush.bf16.msra.mxu1 %v3068_v36  ;;  %v1371_v44 = vpop.f32.mrf.mxu0  ;;  %v1385_v45 = vpop.f32.mrf.mxu1 }
  0xed   :  { %v1372_v49 = vadd.f32 %v1371_v44, %v1358_v43  ;;  %1904 = vmatpush.bf16.msra.mxu3 %v3087_v32  ;;  %v3085_v43 = vld [vmem:[#allocation4 + $0xc8] sm:$0xff] }
  0xee   :  { %1893 = vmatpush.bf16.msra.mxu2 %v3076_v11  ;;  %v3098_v11 = vld [vmem:[%s3295_s4] ss:$0 sm:$0xff] }
  0xef   :  { %1866 = vmatmul.bf16.vlgmr.msra.gmra.mxu0 %v1594_v37  ;;  %v1386_v52 = vadd.f32 %v1385_v45, %v1372_v49  ;;  %v3084_v45 = vld [vmem:[#allocation4 + $0xc0] sm:$0xff] }
  0xf1   :  { %1905 = vmatpush.bf16.msra.mxu3 %v3086_v38 }
  0xf4   :  { %v1373_v53 = vpop.f32.mrf.mxu0  ;;  %v1413_v55 = vpop.f32.mrf.mxu3 }
  0xf5   :  { %v1399_v51 = vpop.f32.mrf.mxu2  ;;  %v1374_v58 = vadd.f32 %v1373_v53, %v1360_v50  ;;  %v1387_v59 = vpop.f32.mrf.mxu1  ;;  %1906 = vmatpush.bf16.msra.mxu3 %v3085_v43 }
  0xf6   :  { %v1400_v61 = vadd.f32 %v1399_v51, %v1386_v52 }
  0xf7   :  { %v1388_v62 = vadd.f32 %v1387_v59, %v1374_v58 }
  0xf8   :  { %v1414_v57 = vadd.f32 %v1413_v55, %v1400_v61 }
  0xf9   :  { %1907 = vmatpush.bf16.msra.mxu3 %v3084_v45 }
  0xfa   :  { %v1587_v2 = vmax.f32 %v1414_v57, 0.0 }
  0xfc   :  { %v1415_v1 = vpop.f32.mrf.mxu3 }
  0xfd   :  { %v1401_v63 = vpop.f32.mrf.mxu2 }
  0xfe   :  { %v1402_v0 = vadd.f32 %v1401_v63, %v1388_v62 }
 0x100   :  { %v1416_v6 = vadd.f32 %v1415_v1, %v1402_v0 }
 0x102   :  { %v1591_v3 = vmax.f32 %v1416_v6, 0.0 }
 0x104   :  { %v1595_v4 = vpack.c.bf16 %v1591_v3, %v1587_v2 }
 0x106   :  { %1880 = vmatmul.bf16.vlgmr.msra.gmra.mxu1 %v1595_v4 }
 0x10c   :  { %v1427_v9 = vpop.f32.mrf.mxu0  ;;  %v1441_v10 = vpop.f32.mrf.mxu1 }
 0x10d   :  { %v1428_v13 = vadd.f32 %v1427_v9, %v254_v12 }
 0x10f   :  { %v1442_v35 = vadd.f32 %v1441_v10, %v1428_v13 }
 0x114   :  { %v1429_v23 = vpop.f32.mrf.mxu0  ;;  %v1443_v16 = vpop.f32.mrf.mxu1 }
 0x115   :  { %v1455_v14 = vpop.f32.mrf.mxu2  ;;  %v1469_v39 = vpop.f32.mrf.mxu3  ;;  %v1430_v17 = vadd.f32 %v1429_v23, %v254_v12 }
 0x116   :  { %v1456_v18 = vadd.f32 %v1455_v14, %v1442_v35 }
 0x117   :  { %v1444_v19 = vadd.f32 %v1443_v16, %v1430_v17 }
 0x118   :  { %v1470_v24 = vadd.f32 %v1469_v39, %v1456_v18 }
 0x11d   :  { %v1457_v21 = vpop.f32.mrf.mxu2  ;;  %v1471_v29 = vpop.f32.mrf.mxu3 }
 0x11e   :  { %v1458_v28 = vadd.f32 %v1457_v21, %v1444_v19 }
 0x120   :  { %v1472_v31 = vadd.f32 %v1471_v29, %v1458_v28 }
 0x12c   :  { %v1483_v25 = vpop.f32.mrf.mxu0  ;;  %v1497_v27 = vpop.f32.mrf.mxu1 }
 0x12d   :  { %v1484_v30 = vadd.f32 %v1483_v25, %v1470_v24 }
 0x12f   :  { %v1498_v33 = vadd.f32 %v1497_v27, %v1484_v30 }
 0x131   :  { %v1588_v40 = vmax.f32 %v1498_v33, 0.0 }
 0x134   :  { %v1485_v34 = vpop.f32.mrf.mxu0  ;;  %v1499_v37 = vpop.f32.mrf.mxu1 }
 0x135   :  { %v1486_v36 = vadd.f32 %v1485_v34, %v1472_v31  ;;  %v1511_v46 = vpop.f32.mrf.mxu2  ;;  %v1525_v47 = vpop.f32.mrf.mxu3 }
 0x136   :  { %v1512_v50 = vadd.f32 %v1511_v46, %v255_v48 }
 0x137   :  { %v1500_v41 = vadd.f32 %v1499_v37, %v1486_v36 }
 0x138   :  { %v1526_v55 = vadd.f32 %v1525_v47, %v1512_v50 }
 0x139   :  { %v1592_v42 = vmax.f32 %v1500_v41, 0.0 }
 0x13b   :  { %v1596_v44 = vpack.c.bf16 %v1592_v42, %v1588_v40 }
 0x13d   :  { %1894 = vmatmul.bf16.vlgmr.msra.gmra.mxu2 %v1596_v44  ;;  %v1513_v49 = vpop.f32.mrf.mxu2  ;;  %v1527_v51 = vpop.f32.mrf.mxu3 }
 0x13e   :  { %v1514_v56 = vadd.f32 %v1513_v49, %v255_v48 }
 0x140   :  { %v1528_v60 = vadd.f32 %v1527_v51, %v1514_v56 }
 0x14c   :  { %v1539_v52 = vpop.f32.mrf.mxu0  ;;  %v1553_v53 = vpop.f32.mrf.mxu1 }
 0x14d   :  { %v1540_v58 = vadd.f32 %v1539_v52, %v1526_v55 }
 0x14f   :  { %v1554_v63 = vadd.f32 %v1553_v53, %v1540_v58 }
 0x154   :  { %v1567_v59 = vpop.f32.mrf.mxu2  ;;  %v1581_v61 = vpop.f32.mrf.mxu3 }
 0x155   :  { %v1541_v62 = vpop.f32.mrf.mxu0  ;;  %v1568_v0 = vadd.f32 %v1567_v59, %v1554_v63  ;;  %v1555_v1 = vpop.f32.mrf.mxu1 }
 0x156   :  { %v1542_v57 = vadd.f32 %v1541_v62, %v1528_v60 }
 0x157   :  { %v1582_v3 = vadd.f32 %v1581_v61, %v1568_v0 }
 0x158   :  { %v1556_v6 = vadd.f32 %v1555_v1, %v1542_v57 }
 0x159   :  { %v1589_v7 = vmax.f32 %v1582_v3, 0.0 }
 0x15c   :  { %v1569_v2 = vpop.f32.mrf.mxu2  ;;  %v1583_v4 = vpop.f32.mrf.mxu3 }
 0x15d   :  { %v1570_v54 = vadd.f32 %v1569_v2, %v1556_v6 }
 0x15f   :  { %v1584_v5 = vadd.f32 %v1583_v4, %v1570_v54 }
 0x161   :  { %v1593_v8 = vmax.f32 %v1584_v5, 0.0 }
 0x163   :  { %v1597_v9 = vpack.c.bf16 %v1593_v8, %v1589_v7 }
 0x165   :  { %1908 = vmatmul.bf16.vlgmr.msra.gmra.mxu3 %v1597_v9 }
 0x16c   :  { %v1867_v10 = vpop.f32.mrf.mxu0 }
 0x16d   :  { %v1868_v13 = vadd.f32 %v3098_v11, %v1867_v10 }
 0x174   :  { %v1869_v23 = vpop.f32.mrf.mxu0 }
 0x175   :  { %v1870_v17 = vadd.f32 %v3098_v11, %v1869_v23 }
 0x183   :  { %v1881_v12 = vpop.f32.mrf.mxu1 }
 0x184   :  { %v1882_v14 = vadd.f32 %v1881_v12, %v1868_v13 }
 0x18b   :  { %v1883_v39 = vpop.f32.mrf.mxu1 }
 0x18c   :  { %v1884_v19 = vadd.f32 %v1883_v39, %v1870_v17 }
 0x1c0   :  { %v1895_v22 = vpop.f32.mrf.mxu2 }
 0x1c1   :  { %v1896_v15 = vadd.f32 %v1895_v22, %v1882_v14 }
 0x1c8   :  { %v1897_v18 = vpop.f32.mrf.mxu2 }
 0x1c9   :  { %v1898_v20 = vadd.f32 %v1897_v18, %v1884_v19 }
 0x1e8   :  { %v1909_v35 = vpop.f32.mrf.mxu3 }
 0x1e9   :  { %v1910_v16 = vadd.f32 %v1909_v35, %v1896_v15 }
 0x1eb   :  { %1914 = vmax.xlane.f32.xlu0 %v1910_v16 }
 0x1f0   :  { %v1911_v21 = vpop.f32.mrf.mxu3 }
 0x1f1   :  { %v1912_v24 = vadd.f32 %v1911_v21, %v1898_v20 }
 0x1f3   :  { %1916 = vmax.xlane.f32.xlu0 %v1912_v24 }
 0x25e   :  { %v1915_v25 = vpop.xlane.xlu0 %1914 }
 0x25f   :  { %v1918_v26 = vsub.f32 %v1910_v16, %v1915_v25 }
 0x261   :  { %v1920_v27 = vmul.f32 1.442695, %v1918_v26 }
 0x263   :  { %3099 = vpow2.f32 %v1920_v27 }
 0x266   :  { %v1917_v28 = vpop.xlane.xlu0 %1916 }
 0x267   :  { %v1919_v29 = vsub.f32 %v1912_v24, %v1917_v28 }
 0x269   :  { %v3100_v30 = vpop.eup %3099  ;;  %v1922_v31 = vmul.f32 1.442695, %v1919_v29 }
 0x26a   :  { %1924 = vadd.xlane.f32.xlu1 %v3100_v30 }
 0x26b   :  { %3101 = vpow2.f32 %v1922_v31 }
 0x271   :  { %v3102_v32 = vpop.eup %3101 }
 0x272   :  { %1926 = vadd.xlane.f32.xlu1 %v3102_v32 }
 0x2dd   :  { %v1925_v33 = vpop.xlane.xlu1 %1924 }
 0x2de   :  { %3103 = vlog2.f32 %v1925_v33 }
 0x2e4   :  { %v3104_v34 = vpop.eup %3103 }
 0x2e5   :  { %v1929_v36 = vmul.f32 0.6931472, %v3104_v34  ;;  %v1927_v37 = vpop.xlane.xlu1 %1926 }
 0x2e6   :  { %3105 = vlog2.f32 %v1927_v37 }
 0x2e7   :  { %v1932_v38 = vsub.f32 %v1918_v26, %v1929_v36 }
 0x2e9   :  { %1934 = vst [vmem:[%s3296_s5] sm:$0xff] %v1932_v38 }
 0x2ec   :  { %v3106_v40 = vpop.eup %3105 }
 0x2ed   :  { %v1931_v41 = vmul.f32 0.6931472, %v3106_v40 }
 0x2ef   :  { %v1933_v42 = vsub.f32 %v1919_v29, %v1931_v41 }
 0x2f1   :  { %1935 = vst [vmem:[%s3296_s5 + $0x8] sm:$0xff] %v1933_v42 }
 0x2f2   :  { %1940 = vsyncpa [#allocation3], 1 }
 0x2f3   :  { %1941 = vsyncpa [#allocation5], 1 }

</bundles_post_ra>
